<compile_context>
chip_gen: v6e
topology: v6e:2x2x1
jax: 0.10.0
libtpu: 0.0.40
codegen_flags: <defaults>
</compile_context>

<pallas_src>
import jax
import jax.numpy as jnp
from jax import lax
from jax.experimental import pallas as pl
from jax.experimental.pallas import tpu as pltpu


def _round_up(x, m):
    return ((x + m - 1) // m) * m


def _ceil_div(a, b):
    return -(-a // b)


# --------------------------------------------------------------------------
# Pallas kernels
# --------------------------------------------------------------------------
def _conv_bias_relu_poolw_kernel(a_ref, w_ref, b_ref, o_ref, g_ref):
    """Conv-as-GEMM + bias + ReLU + adjacent-column (w-parity) max for one tile.

    a_ref : (tm, K)       bf16 im2col rows in full-resolution (b, h, w) order
    w_ref : (K, Cout)     bf16
    b_ref : (1, Cout)     f32
    o_ref : (tm//2, Cout) bf16 -- rows ordered (b, h, wo); the h-pair max of
                                  the 2x2 pool is finished in the wrapper.
    g_ref : (tm, Cout)    f32  VMEM scratch holding the GEMM result
    """
    g_ref[...] = jnp.dot(a_ref[...], w_ref[...],
                         preferred_element_type=jnp.float32)
    half = o_ref.shape[0]
    # Strided sublane reads pick the even / odd w columns of each image row.
    ev = g_ref[pl.ds(0, half, 2), :]
    od = g_ref[pl.ds(1, half, 2), :]
    # relu(max(.) + b) == max(relu(. + b)) (monotonicity) -> one bias add/ReLU.
    o_ref[...] = jnp.maximum(jnp.maximum(ev, od) + b_ref[...],
                             0.0).astype(o_ref.dtype)


def _fc_kernel(x_ref, w_ref, b_ref, o_ref):
    """o = x @ w + b for one row tile (bf16 operands, f32 MXU accumulation)."""
    o_ref[...] = (jnp.dot(x_ref[...], w_ref[...],
                          preferred_element_type=jnp.float32)
                  + b_ref[...]).astype(o_ref.dtype)


# --------------------------------------------------------------------------
# Wrappers
# --------------------------------------------------------------------------
_MAX_ROW_TILE = 1024      # per-step LHS: 1024 x 400 x 2B x 2 bufs ~= 1.6 MiB


def _pick_row_tile(n_rows, max_tile=_MAX_ROW_TILE):
    """Row tile: multiple of 32 (so tile and tile//2 pack bf16 sublanes),
    aiming for >= 4 grid steps at small batch, capped for large batch."""
    t = _round_up(max(1, _ceil_div(n_rows, 4)), 32)
    return max(32, min(max_tile, t))


def conv_relu_pool(x_nhwc, w_mat, b_row, *, ksize=5, pad=2):
    """x_nhwc: (B,H,W,Cin) f32/bf16; w_mat: (K,Cout) bf16; b_row: (1,Cout) f32.

    Returns the conv+ReLU+2x2-maxpool output as (B, H//2, W//2, Cout) bf16.
    """
    B, H, W, Cin = x_nhwc.shape
    K, Cout = w_mat.shape
    assert K == ksize * ksize * Cin
    Ho, Wo = H // 2, W // 2

    # bf16 early so all im2col glue traffic is half-width.
    xp = jnp.pad(x_nhwc.astype(jnp.bfloat16),
                 ((0, 0), (pad, pad), (pad, pad), (0, 0)))
    # Single im2col tensor with (kh, kw, cin) minor order -> (B, H, W, K).
    # The reshape to (B*H*W, K) is contiguous (free); the kernel reads it
    # directly -- no per-pool-position copies, no K padding.
    cols = [xp[:, kh:kh + H, kw:kw + W, :]
            for kh in range(ksize) for kw in range(ksize)]
    patches = jnp.concatenate(cols, axis=-1).reshape(B * H * W, K)

    M = B * H * W                      # full-resolution GEMM rows (even)
    tm = _pick_row_tile(M)
    m_pad = _round_up(M, tm)
    if m_pad != M:
        patches = jnp.pad(patches, ((0, m_pad - M), (0, 0)))

    out = pl.pallas_call(
        _conv_bias_relu_poolw_kernel,
        out_shape=jax.ShapeDtypeStruct((m_pad // 2, Cout), jnp.bfloat16),
        grid_spec=pltpu.PrefetchScalarGridSpec(
            num_scalar_prefetch=0,
            grid=(m_pad // tm,),
            in_specs=[pl.BlockSpec((tm, K), lambda i: (i, 0)),
                      pl.BlockSpec((K, Cout), lambda i: (0, 0)),
                      pl.BlockSpec((1, Cout), lambda i: (0, 0))],
            out_specs=pl.BlockSpec((tm // 2, Cout), lambda i: (i, 0)),
            scratch_shapes=[pltpu.VMEM((tm, Cout), jnp.float32)]),
        compiler_params=pltpu.CompilerParams(
            dimension_semantics=("parallel",)),
    )(patches, w_mat, b_row)

    # Kernel rows are (b, h, wo); finish the 2x2 pool with the h-pair max on
    # this small bf16 tensor (exact, since ReLU/max are monotone).
    out = out[:M // 2].reshape(B, Ho, 2, Wo, Cout)
    return jnp.max(out, axis=2)


def linear(x_flat, w_mat, b_row):
    """x_flat: (B, Kf) f32/bf16; w_mat: (Kf, Nout) bf16; b_row: (1, Nout) f32."""
    B, Kf = x_flat.shape
    Kf_w, Nout = w_mat.shape
    assert Kf == Kf_w
    tb = max(16, min(256, _round_up(max(1, _ceil_div(B, 4)), 16)))
    b_pad = _round_up(B, tb)
    x = x_flat.astype(jnp.bfloat16)
    if b_pad != B:
        x = jnp.pad(x, ((0, b_pad - B), (0, 0)))
    out = pl.pallas_call(
        _fc_kernel,
        out_shape=jax.ShapeDtypeStruct((b_pad, Nout), jnp.float32),
        grid_spec=pltpu.PrefetchScalarGridSpec(
            num_scalar_prefetch=0,
            grid=(b_pad // tb,),
            in_specs=[pl.BlockSpec((tb, Kf), lambda i: (i, 0)),
                      pl.BlockSpec((Kf, Nout), lambda i: (0, 0)),
                      pl.BlockSpec((1, Nout), lambda i: (0, 0))],
            out_specs=pl.BlockSpec((tb, Nout), lambda i: (i, 0))),
        compiler_params=pltpu.CompilerParams(
            dimension_semantics=("parallel",)),
    )(x, w_mat, b_row)
    return out[:B]


# --------------------------------------------------------------------------
# Parameters: torch layout, plus a one-time GEMM packing step
# --------------------------------------------------------------------------
def init_params(key, num_classes):
    ks = jax.random.split(key, 6)
    s = 0.05
    return {
        "w1": jax.random.normal(ks[0], (16, 3, 5, 5), jnp.float32) * s,
        "b1": jax.random.normal(ks[1], (16,), jnp.float32) * s,
        "w2": jax.random.normal(ks[2], (32, 16, 5, 5), jnp.float32) * s,
        "b2": jax.random.normal(ks[3], (32,), jnp.float32) * s,
        "wf": jax.random.normal(ks[4], (num_classes, 7 * 7 * 32), jnp.float32) * s,
        "bf": jax.random.normal(ks[5], (num_classes,), jnp.float32) * s,
    }


def prepare_params(params):
    """One-time packing of torch-layout params into GEMM-ready bf16 matrices."""
    def pack_conv(w_oihw, bias):
        cout, cin, kh, kw = w_oihw.shape
        # (Cout,Cin,K,K) -> (kh,kw,cin,cout) -> (kh*kw*cin, cout); natural K.
        w = jnp.transpose(w_oihw, (2, 3, 1, 0)).reshape(kh * kw * cin, cout)
        return w.astype(jnp.bfloat16), bias.reshape(1, cout).astype(jnp.float32)

    w1, b1 = pack_conv(params["w1"], params["b1"])           # K = 75
    w2, b2 = pack_conv(params["w2"], params["b2"])           # K = 400

    # torch flattens features in (C,H,W) order; our conv2 output flattens
    # (H,W,C).  Permute FC-weight columns once so no runtime feature transpose.
    wf = params["wf"]                                         # (ncls, 32*7*7)
    ncls = wf.shape[0]
    wf = wf.reshape(ncls, 32, 7, 7).transpose(0, 2, 3, 1).reshape(ncls, 7 * 7 * 32)
    wf = jnp.transpose(wf).astype(jnp.bfloat16)               # (1568, ncls)
    bf = params["bf"].reshape(1, ncls).astype(jnp.float32)
    return {"w1": w1, "b1": b1, "w2": w2, "b2": b2, "wf": wf, "bf": bf}


def cnnet_forward(packed, x_nchw):
    """Reproduces CnNet.forward.  x_nchw: (B, 3, 28, 28) float32."""
    x = jnp.transpose(x_nchw, (0, 2, 3, 1))                   # NCHW -> NHWC
    h1 = conv_relu_pool(x, packed["w1"], packed["b1"])        # (B,14,14,16) bf16
    h2 = conv_relu_pool(h1, packed["w2"], packed["b2"])       # (B, 7, 7,32) bf16
    flat = h2.reshape(h2.shape[0], -1)                        # (B, 1568), (h,w,c)
    return linear(flat, packed["wf"], packed["bf"])           # (B, num_classes)


# --------------------------------------------------------------------------
# Pure-JAX reference (correctness check only)
# --------------------------------------------------------------------------
def cnnet_reference(params, x_nchw):
    def conv(x, w, b):
        y = lax.conv_general_dilated(
            x, w, window_strides=(1, 1), padding=((2, 2), (2, 2)),
            dimension_numbers=("NCHW", "OIHW", "NCHW"),
            precision=lax.Precision.HIGHEST)
        return y + b.reshape(1, -1, 1, 1)

    def pool(x):
        return lax.reduce_window(x, -jnp.inf, lax.max,
                                 (1, 1, 2, 2), (1, 1, 2, 2), "VALID")

    h = pool(jnp.maximum(conv(x_nchw, params["w1"], params["b1"]), 0.0))
    h = pool(jnp.maximum(conv(h, params["w2"], params["b2"]), 0.0))
    flat = h.reshape(h.shape[0], -1)
    return flat @ params["wf"].T + params["bf"]


if __name__ == "__main__":
    num_classes = 4
    key = jax.random.PRNGKey(0)
    pkey, xkey = jax.random.split(key)
    params = init_params(pkey, num_classes)
    packed = prepare_params(params)                 # one-time weight packing
    x = jax.random.normal(xkey, (2, 3, 28, 28), jnp.float32)

    fwd = jax.jit(cnnet_forward)
    out = jax.block_until_ready(fwd(packed, x))
    ref = jax.block_until_ready(cnnet_reference(params, x))

    assert out.shape == (2, num_classes)
    # bf16 GEMM operands / bf16 activations with f32 accumulation.
    assert jnp.allclose(out, ref, rtol=2e-2, atol=2e-2), (out, ref)
    print("KERNEL_OK")
</pallas_src>

<mosaic_0001>
module attributes {stable_mosaic.version = 11 : i64} {
  func.func @_conv_bias_relu_poolw_kernel(%arg0: i32, %arg1: memref<416x75xbf16, #tpu.memory_space<vmem>>, %arg2: memref<75x16xbf16, #tpu.memory_space<vmem>>, %arg3: memref<1x16xf32, #tpu.memory_space<vmem>>, %arg4: memref<208x16xbf16, #tpu.memory_space<vmem>>, %arg5: memref<416x16xf32, #tpu.memory_space<vmem>>) attributes {dimension_semantics = [#tpu.dimension_semantics<parallel>], iteration_bounds = array<i64: 4>, scalar_prefetch = 0 : i64, scratch_operands = 1 : i64, tpu.core_type = #tpu.core_type<tc>, window_params = [{transform_indices = @transform_0, window_bounds = array<i64: 416, 75>}, {pipeline_mode = #tpu.pipeline_mode<synchronous>, transform_indices = @transform_1, window_bounds = array<i64: 75, 16>}, {pipeline_mode = #tpu.pipeline_mode<synchronous>, transform_indices = @transform_2, window_bounds = array<i64: 1, 16>}, {transform_indices = @transform_3, window_bounds = array<i64: 208, 16>}]} {
    %c0 = arith.constant 0 : index
    %c0_0 = arith.constant 0 : index
    %0 = vector.load %arg1[%c0, %c0_0] : memref<416x75xbf16, #tpu.memory_space<vmem>>, vector<416x75xbf16>
    %c0_1 = arith.constant 0 : index
    %c0_2 = arith.constant 0 : index
    %1 = vector.load %arg2[%c0_1, %c0_2] : memref<75x16xbf16, #tpu.memory_space<vmem>>, vector<75x16xbf16>
    %cst = arith.constant dense<0.000000e+00> : vector<416x16xf32>
    %2 = tpu.matmul %0, %1, %cst {dimension_numbers = #tpu.dot_dimension_numbers<[1], [0], [0], [1], [0, 0, 1, 1], [], []>} : vector<416x75xbf16>, vector<75x16xbf16>, vector<416x16xf32> -> vector<416x16xf32>
    %c0_3 = arith.constant 0 : index
    %c0_4 = arith.constant 0 : index
    %3 = vector.load %arg5[%c0_3, %c0_4] : memref<416x16xf32, #tpu.memory_space<vmem>>, vector<416x16xf32>
    tpu.vector_store %arg5[%c0_3, %c0_4], %2 {strides = array<i32>} : memref<416x16xf32, #tpu.memory_space<vmem>>, vector<416x16xf32>,
    %c0_5 = arith.constant 0 : index
    %c0_6 = arith.constant 0 : index
    %4 = tpu.strided_load %arg5[%c0_5, %c0_6] {strides = array<i32: 2, 1>} : memref<416x16xf32, #tpu.memory_space<vmem>>, vector<208x16xf32>
    %c1 = arith.constant 1 : index
    %c0_7 = arith.constant 0 : index
    %5 = tpu.strided_load %arg5[%c1, %c0_7] {strides = array<i32: 2, 1>} : memref<416x16xf32, #tpu.memory_space<vmem>>, vector<208x16xf32>
    %6 = arith.maximumf %4, %5 : vector<208x16xf32>
    %c0_8 = arith.constant 0 : index
    %c0_9 = arith.constant 0 : index
    %7 = vector.load %arg3[%c0_8, %c0_9] : memref<1x16xf32, #tpu.memory_space<vmem>>, vector<1x16xf32>
    %8 = vector.broadcast %7 : vector<1x16xf32> to vector<208x16xf32>
    %9 = arith.addf %6, %8 : vector<208x16xf32>
    %cst_10 = arith.constant 0.000000e+00 : f32
    %10 = vector.broadcast %cst_10 : f32 to vector<208x16xf32>
    %11 = arith.maximumf %9, %10 : vector<208x16xf32>
    %12 = arith.truncf %11 : vector<208x16xf32> to vector<208x16xbf16>
    %c0_11 = arith.constant 0 : index
    %c0_12 = arith.constant 0 : index
    %13 = vector.load %arg4[%c0_11, %c0_12] : memref<208x16xbf16, #tpu.memory_space<vmem>>, vector<208x16xbf16>
    tpu.vector_store %arg4[%c0_11, %c0_12], %12 {strides = array<i32>} : memref<208x16xbf16, #tpu.memory_space<vmem>>, vector<208x16xbf16>,
    return
  }
  func.func @transform_0(%arg0: i32) -> (i32, i32) {
    %c0_i32 = arith.constant 0 : i32
    %c0_i32_0 = arith.constant 0 : i32
    return %arg0, %c0_i32 : i32, i32
  }
  func.func @transform_1(%arg0: i32) -> (i32, i32) {
    %c0_i32 = arith.constant 0 : i32
    %c0_i32_0 = arith.constant 0 : i32
    %c0_i32_1 = arith.constant 0 : i32
    return %c0_i32, %c0_i32_0 : i32, i32
  }
  func.func @transform_2(%arg0: i32) -> (i32, i32) {
    %c0_i32 = arith.constant 0 : i32
    %c0_i32_0 = arith.constant 0 : i32
    %c0_i32_1 = arith.constant 0 : i32
    return %c0_i32, %c0_i32_0 : i32, i32
  }
  func.func @transform_3(%arg0: i32) -> (i32, i32) {
    %c0_i32 = arith.constant 0 : i32
    %c0_i32_0 = arith.constant 0 : i32
    return %arg0, %c0_i32 : i32, i32
  }
}

module attributes {stable_mosaic.version = 11 : i64} {
  func.func @_conv_bias_relu_poolw_kernel(%arg0: i32, %arg1: memref<128x400xbf16, #tpu.memory_space<vmem>>, %arg2: memref<400x32xbf16, #tpu.memory_space<vmem>>, %arg3: memref<1x32xf32, #tpu.memory_space<vmem>>, %arg4: memref<64x32xbf16, #tpu.memory_space<vmem>>, %arg5: memref<128x32xf32, #tpu.memory_space<vmem>>) attributes {dimension_semantics = [#tpu.dimension_semantics<parallel>], iteration_bounds = array<i64: 4>, scalar_prefetch = 0 : i64, scratch_operands = 1 : i64, tpu.core_type = #tpu.core_type<tc>, window_params = [{transform_indices = @transform_0, window_bounds = array<i64: 128, 400>}, {pipeline_mode = #tpu.pipeline_mode<synchronous>, transform_indices = @transform_1, window_bounds = array<i64: 400, 32>}, {pipeline_mode = #tpu.pipeline_mode<synchronous>, transform_indices = @transform_2, window_bounds = array<i64: 1, 32>}, {transform_indices = @transform_3, window_bounds = array<i64: 64, 32>}]} {
    %c0 = arith.constant 0 : index
    %c0_0 = arith.constant 0 : index
    %0 = vector.load %arg1[%c0, %c0_0] : memref<128x400xbf16, #tpu.memory_space<vmem>>, vector<128x400xbf16>
    %c0_1 = arith.constant 0 : index
    %c0_2 = arith.constant 0 : index
    %1 = vector.load %arg2[%c0_1, %c0_2] : memref<400x32xbf16, #tpu.memory_space<vmem>>, vector<400x32xbf16>
    %cst = arith.constant dense<0.000000e+00> : vector<128x32xf32>
    %2 = tpu.matmul %0, %1, %cst {dimension_numbers = #tpu.dot_dimension_numbers<[1], [0], [0], [1], [0, 0, 1, 1], [], []>} : vector<128x400xbf16>, vector<400x32xbf16>, vector<128x32xf32> -> vector<128x32xf32>
    %c0_3 = arith.constant 0 : index
    %c0_4 = arith.constant 0 : index
    %3 = vector.load %arg5[%c0_3, %c0_4] : memref<128x32xf32, #tpu.memory_space<vmem>>, vector<128x32xf32>
    tpu.vector_store %arg5[%c0_3, %c0_4], %2 {strides = array<i32>} : memref<128x32xf32, #tpu.memory_space<vmem>>, vector<128x32xf32>,
    %c0_5 = arith.constant 0 : index
    %c0_6 = arith.constant 0 : index
    %4 = tpu.strided_load %arg5[%c0_5, %c0_6] {strides = array<i32: 2, 1>} : memref<128x32xf32, #tpu.memory_space<vmem>>, vector<64x32xf32>
    %c1 = arith.constant 1 : index
    %c0_7 = arith.constant 0 : index
    %5 = tpu.strided_load %arg5[%c1, %c0_7] {strides = array<i32: 2, 1>} : memref<128x32xf32, #tpu.memory_space<vmem>>, vector<64x32xf32>
    %6 = arith.maximumf %4, %5 : vector<64x32xf32>
    %c0_8 = arith.constant 0 : index
    %c0_9 = arith.constant 0 : index
    %7 = vector.load %arg3[%c0_8, %c0_9] : memref<1x32xf32, #tpu.memory_space<vmem>>, vector<1x32xf32>
    %8 = vector.broadcast %7 : vector<1x32xf32> to vector<64x32xf32>
    %9 = arith.addf %6, %8 : vector<64x32xf32>
    %cst_10 = arith.constant 0.000000e+00 : f32
    %10 = vector.broadcast %cst_10 : f32 to vector<64x32xf32>
    %11 = arith.maximumf %9, %10 : vector<64x32xf32>
    %12 = arith.truncf %11 : vector<64x32xf32> to vector<64x32xbf16>
    %c0_11 = arith.constant 0 : index
    %c0_12 = arith.constant 0 : index
    %13 = vector.load %arg4[%c0_11, %c0_12] : memref<64x32xbf16, #tpu.memory_space<vmem>>, vector<64x32xbf16>
    tpu.vector_store %arg4[%c0_11, %c0_12], %12 {strides = array<i32>} : memref<64x32xbf16, #tpu.memory_space<vmem>>, vector<64x32xbf16>,
    return
  }
  func.func @transform_0(%arg0: i32) -> (i32, i32) {
    %c0_i32 = arith.constant 0 : i32
    %c0_i32_0 = arith.constant 0 : i32
    return %arg0, %c0_i32 : i32, i32
  }
  func.func @transform_1(%arg0: i32) -> (i32, i32) {
    %c0_i32 = arith.constant 0 : i32
    %c0_i32_0 = arith.constant 0 : i32
    %c0_i32_1 = arith.constant 0 : i32
    return %c0_i32, %c0_i32_0 : i32, i32
  }
  func.func @transform_2(%arg0: i32) -> (i32, i32) {
    %c0_i32 = arith.constant 0 : i32
    %c0_i32_0 = arith.constant 0 : i32
    %c0_i32_1 = arith.constant 0 : i32
    return %c0_i32, %c0_i32_0 : i32, i32
  }
  func.func @transform_3(%arg0: i32) -> (i32, i32) {
    %c0_i32 = arith.constant 0 : i32
    %c0_i32_0 = arith.constant 0 : i32
    return %arg0, %c0_i32 : i32, i32
  }
}

module attributes {stable_mosaic.version = 11 : i64} {
  func.func @_fc_kernel(%arg0: i32, %arg1: memref<16x1568xbf16, #tpu.memory_space<vmem>>, %arg2: memref<1568x4xbf16, #tpu.memory_space<vmem>>, %arg3: memref<1x4xf32, #tpu.memory_space<vmem>>, %arg4: memref<16x4xf32, #tpu.memory_space<vmem>>) attributes {dimension_semantics = [#tpu.dimension_semantics<parallel>], iteration_bounds = array<i64: 1>, scalar_prefetch = 0 : i64, scratch_operands = 0 : i64, tpu.core_type = #tpu.core_type<tc>, window_params = [{transform_indices = @transform_0, window_bounds = array<i64: 16, 1568>}, {pipeline_mode = #tpu.pipeline_mode<synchronous>, transform_indices = @transform_1, window_bounds = array<i64: 1568, 4>}, {pipeline_mode = #tpu.pipeline_mode<synchronous>, transform_indices = @transform_2, window_bounds = array<i64: 1, 4>}, {transform_indices = @transform_3, window_bounds = array<i64: 16, 4>}]} {
    %c0 = arith.constant 0 : index
    %c0_0 = arith.constant 0 : index
    %0 = vector.load %arg1[%c0, %c0_0] : memref<16x1568xbf16, #tpu.memory_space<vmem>>, vector<16x1568xbf16>
    %c0_1 = arith.constant 0 : index
    %c0_2 = arith.constant 0 : index
    %1 = vector.load %arg2[%c0_1, %c0_2] : memref<1568x4xbf16, #tpu.memory_space<vmem>>, vector<1568x4xbf16>
    %cst = arith.constant dense<0.000000e+00> : vector<16x4xf32>
    %2 = tpu.matmul %0, %1, %cst {dimension_numbers = #tpu.dot_dimension_numbers<[1], [0], [0], [1], [0, 0, 1, 1], [], []>} : vector<16x1568xbf16>, vector<1568x4xbf16>, vector<16x4xf32> -> vector<16x4xf32>
    %c0_3 = arith.constant 0 : index
    %c0_4 = arith.constant 0 : index
    %3 = vector.load %arg3[%c0_3, %c0_4] : memref<1x4xf32, #tpu.memory_space<vmem>>, vector<1x4xf32>
    %4 = vector.broadcast %3 : vector<1x4xf32> to vector<16x4xf32>
    %5 = arith.addf %2, %4 : vector<16x4xf32>
    %c0_5 = arith.constant 0 : index
    %c0_6 = arith.constant 0 : index
    %6 = vector.load %arg4[%c0_5, %c0_6] : memref<16x4xf32, #tpu.memory_space<vmem>>, vector<16x4xf32>
    tpu.vector_store %arg4[%c0_5, %c0_6], %5 {strides = array<i32>} : memref<16x4xf32, #tpu.memory_space<vmem>>, vector<16x4xf32>,
    return
  }
  func.func @transform_0(%arg0: i32) -> (i32, i32) {
    %c0_i32 = arith.constant 0 : i32
    %c0_i32_0 = arith.constant 0 : i32
    return %arg0, %c0_i32 : i32, i32
  }
  func.func @transform_1(%arg0: i32) -> (i32, i32) {
    %c0_i32 = arith.constant 0 : i32
    %c0_i32_0 = arith.constant 0 : i32
    %c0_i32_1 = arith.constant 0 : i32
    return %c0_i32, %c0_i32_0 : i32, i32
  }
  func.func @transform_2(%arg0: i32) -> (i32, i32) {
    %c0_i32 = arith.constant 0 : i32
    %c0_i32_0 = arith.constant 0 : i32
    %c0_i32_1 = arith.constant 0 : i32
    return %c0_i32, %c0_i32_0 : i32, i32
  }
  func.func @transform_3(%arg0: i32) -> (i32, i32) {
    %c0_i32 = arith.constant 0 : i32
    %c0_i32_0 = arith.constant 0 : i32
    return %arg0, %c0_i32 : i32, i32
  }
}

</mosaic_0001>

<bundles_post_ra>
// kernel: cnnet_forward.3
= control target key start
LH: loop header
LB: loop body
LE: loop exit
PB: predicated region body
PF: predicated region fallthrough
CT: control target
= control target key end

     0   :  { %s1442_s12 = smov 0   ;;  %s1672_s0 = inlined_call_operand.vmem [shape: bf16[1664,75], index: 0, kind: input, shape index: {}]   ;;  %s1673_s1 = inlined_call_operand.vmem [shape: bf16[75,16], index: 1, kind: input, shape index: {}]   ;;  %s1674_s2 = inlined_call_operand.vmem [shape: f32[1,16], index: 2, kind: input, shape index: {}]   ;;  %s1675_s3 = inlined_call_operand.vmem [shape: bf16[832,16], index: 3, kind: output, shape index: {}]  }
   0x1 LB: > { %s1151_s13 = sadd.s32 4294967295, %s1419_s12   ;;  %p1155_p0 = scmp.ge.s32.totalorder %s1419_s12, 1  ;;  %s1419_s12 = sphi %s1442_s12, %s13_s12  }
   0x2   : > { %p138_p1 = scmp.lt.s32.totalorder %s1419_s12, 5 }
   0x4   : > { %p139_p2 = pnand %p1155_p0, %p138_p1 }
   0x5   : > { %s162_s18 = smul.u32 (!%p139_p2), 52, %s1151_s13 }
   0x6   : > { %142 = sbr.rel (%p139_p2) target bundleno = 301 (0x12d), region = 32 }
   0x7   : > { %p163_p3 = scmp.lt.s32.totalorder (!%p139_p2), %s162_s18, 207  ;;  %s168_s29 = smul.u32 (!%p139_p2), 26, %s1151_s13 }
   0x9   : > { %p169_p4 = scmp.lt.s32.totalorder (!%p139_p2), %s168_s29, 103 }
   0xb   : > { %v1382_v0 = vld [vmem:[%s1673_s1 + $0x20] sm:$0x3f]   ;;  %vm475_vm0 = vcmask 1044480   ;;  %vm476_vm1 = vcmask 1045504   ;;  %v1421_v1 = vmov 65535   ;;  %v1383_v4 = vld [vmem:[%s1673_s1 + $0x18] sm:$0xff]  }
   0xc   : > { %v477_v2 = vsel %vm475_vm0, 4294967295, %v1421_v1  ;;  %v1384_v6 = vld [vmem:[%s1673_s1 + $0x10] sm:$0xff]   ;;  %s1677_s18 = smov (!%p163_p3, %s162_s18), 207  ;;  %v1385_v7 = vld [vmem:[%s1673_s1 + $0x8] sm:$0xff]   ;;  %vm396_vm2 = vcmask 613376   ;;  %v1386_v10 = vld [vmem:[%s1673_s1] sm:$0xff]  }
   0xd   : > { %v478_v3 = vsel %vm476_vm1, %v477_v2, 0  ;;  %s1156_s21 = sshll.u32 %s1677_s18, 2  ;;  %vm723_vm3 = vcmask 130048   ;;  %s1679_s29 = smov (!%p169_p4, %s168_s29), 103  ;;  %v1541_v47 = vld [vmem:[%s1674_s2] ss:$0 sm:$0xff] }
   0xe   : > { %v480_v5 = vand.u32 %v1382_v0, %v478_v3  ;;  %s1467_s26 = scalar_lea.vmem %s1672_s0, %s1156_s21  ;;  %s1157_s5 = sshll.u32 %s1679_s29, 2  ;;  %vm1068_vm4 = vcmask 125952  }
   0xf   : > { %v1387_v8 = vld [vmem:[%s1467_s26] sm:$0xff]   ;;  %v1389_v9 = vld [vmem:[%s1467_s26 + $0x70] sm:$0xff]   ;;  %v1388_v11 = vld [vmem:[%s1467_s26 + $0x8] sm:$0xff]   ;;  %s1558_s8 = scalar_lea.vmem %s1675_s3, %s1157_s5 }
  0x10   : > { %1301 = vmatprep.subr.bf16.mxu0 %v480_v5  ;;  %1363 = vmatprep.subr.bf16.mxu1 %v480_v5  ;;  %v1390_v12 = vld [vmem:[%s1467_s26 + $0x78] sm:$0xff]   ;;  %v1391_v13 = vld [vmem:[%s1467_s26 + $0x10] sm:$0xff]   ;;  %v1393_v14 = vld [vmem:[%s1467_s26 + $0x80] sm:$0xff]  }
  0x11   : > { %1302 = vmatpush3.bf16.msra.mxu0 %v480_v5  ;;  %1368 = vmatpush3.bf16.msra.mxu1 %v480_v5  ;;  %v1392_v15 = vld [vmem:[%s1467_s26 + $0x18] sm:$0xff]   ;;  %v1394_v16 = vld [vmem:[%s1467_s26 + $0x88] sm:$0xff]   ;;  %v1395_v17 = vld [vmem:[%s1467_s26 + $0x20] sm:$0xff]  }
  0x12   : > { %1303 = vmatprep.subr.bf16.mxu0 %v1383_v4  ;;  %1364 = vmatprep.subr.bf16.mxu1 %v1383_v4  ;;  %v1397_v18 = vld [vmem:[%s1467_s26 + $0x90] sm:$0xff]   ;;  %v1396_v19 = vld [vmem:[%s1467_s26 + $0x28] sm:$0xff]   ;;  %v1398_v20 = vld [vmem:[%s1467_s26 + $0x98] sm:$0xff]  }
  0x13   : > { %1311 = vmatprep.mubr.msk.bf16.mxu0 %vm396_vm2, %v1387_v8  ;;  %1339 = vmatprep.mubr.msk.bf16.mxu1 %vm396_vm2, %v1389_v9  ;;  %v1399_v21 = vld [vmem:[%s1467_s26 + $0x30] sm:$0xff]   ;;  %v1401_v22 = vld [vmem:[%s1467_s26 + $0xa0] sm:$0xff]   ;;  %v1400_v23 = vld [vmem:[%s1467_s26 + $0x38] sm:$0xff]  }
  0x14   : > { %v1402_v24 = vld [vmem:[%s1467_s26 + $0xa8] sm:$0xff]   ;;  %v1403_v25 = vld [vmem:[%s1467_s26 + $0x40] sm:$0xff]   ;;  %v1405_v26 = vld [vmem:[%s1467_s26 + $0xb0] sm:$0xff]  }
  0x15   : > { %1304 = vmatpush3.bf16.msra.mxu0 %v1383_v4  ;;  %1369 = vmatpush3.bf16.msra.mxu1 %v1383_v4  ;;  %v1404_v27 = vld [vmem:[%s1467_s26 + $0x48] sm:$0xff]   ;;  %v1406_v28 = vld [vmem:[%s1467_s26 + $0xb8] sm:$0xff]   ;;  %v1407_v29 = vld [vmem:[%s1467_s26 + $0x50] sm:$0xff]  }
  0x16   : > { %1305 = vmatprep.subr.bf16.mxu0 %v1384_v6  ;;  %1365 = vmatprep.subr.bf16.mxu1 %v1384_v6  ;;  %v1409_v30 = vld [vmem:[%s1467_s26 + $0xc0] sm:$0xff]   ;;  %v1408_v31 = vld [vmem:[%s1467_s26 + $0x58] sm:$0xff]   ;;  %v1410_v32 = vld [vmem:[%s1467_s26 + $0xc8] sm:$0xff]  }
  0x17   : > { %v1411_v33 = vld [vmem:[%s1467_s26 + $0x60] sm:$0xff]   ;;  %v1412_v34 = vld [vmem:[%s1467_s26 + $0x68] sm:$0xff]  }
  0x19   : > { %1306 = vmatpush3.bf16.msra.mxu0 %v1384_v6  ;;  %1370 = vmatpush3.bf16.msra.mxu1 %v1384_v6 }
  0x1a   : > { %1307 = vmatprep.subr.bf16.mxu0 %v1385_v7  ;;  %1366 = vmatprep.subr.bf16.mxu1 %v1385_v7 }
  0x1d   : > { %1308 = vmatpush3.bf16.msra.mxu0 %v1385_v7  ;;  %1371 = vmatpush3.bf16.msra.mxu1 %v1385_v7 }
  0x1e   : > { %1309 = vmatprep.subr.bf16.mxu0 %v1386_v10  ;;  %1367 = vmatprep.subr.bf16.mxu1 %v1386_v10 }
  0x21   : > { %1310 = vmatpush3.bf16.msra.mxu0 %v1386_v10  ;;  %1372 = vmatpush3.bf16.msra.mxu1 %v1386_v10 }
  0x24   : > { %1312 = vmatmul.mubr.msk.bf16.vlgmr.msra.gmra.mxu0 %vm396_vm2, %v1388_v11  ;;  %1340 = vmatmul.mubr.msk.bf16.vlgmr.msra.gmra.mxu1 %vm396_vm2, %v1390_v12 }
  0x25   : > { %1315 = vmatprep.mubr.msk.bf16.mxu0 %vm396_vm2, %v1391_v13  ;;  %1343 = vmatprep.mubr.msk.bf16.mxu1 %vm396_vm2, %v1393_v14 }
  0x2c   : > { %1316 = vmatmul.mubr.msk.bf16.gmra.mxu0 %vm396_vm2, %v1392_v15  ;;  %1344 = vmatmul.mubr.msk.bf16.gmra.mxu1 %vm396_vm2, %v1394_v16 }
  0x2d   : > { %1319 = vmatprep.mubr.msk.bf16.mxu0 %vm396_vm2, %v1395_v17  ;;  %1347 = vmatprep.mubr.msk.bf16.mxu1 %vm396_vm2, %v1397_v18 }
  0x34   : > { %1320 = vmatmul.mubr.msk.bf16.gmra.mxu0 %vm396_vm2, %v1396_v19  ;;  %1348 = vmatmul.mubr.msk.bf16.gmra.mxu1 %vm396_vm2, %v1398_v20 }
  0x35   : > { %1323 = vmatprep.mubr.msk.bf16.mxu0 %vm396_vm2, %v1399_v21  ;;  %1351 = vmatprep.mubr.msk.bf16.mxu1 %vm396_vm2, %v1401_v22 }
  0x3c   : > { %1324 = vmatmul.mubr.msk.bf16.gmra.mxu0 %vm396_vm2, %v1400_v23  ;;  %1352 = vmatmul.mubr.msk.bf16.gmra.mxu1 %vm396_vm2, %v1402_v24 }
  0x3d   : > { %1327 = vmatprep.mubr.msk.bf16.mxu0 %vm396_vm2, %v1403_v25  ;;  %1355 = vmatprep.mubr.msk.bf16.mxu1 %vm396_vm2, %v1405_v26 }
  0x44   : > { %1328 = vmatmul.mubr.msk.bf16.gmra.mxu0 %vm396_vm2, %v1404_v27  ;;  %1356 = vmatmul.mubr.msk.bf16.gmra.mxu1 %vm396_vm2, %v1406_v28 }
  0x45   : > { %1331 = vmatprep.mubr.msk.bf16.mxu0 %vm396_vm2, %v1407_v29  ;;  %1359 = vmatprep.mubr.msk.bf16.mxu1 %vm396_vm2, %v1409_v30 }
  0x4c   : > { %1332 = vmatmul.mubr.msk.bf16.gmra.mxu0 %vm396_vm2, %v1408_v31  ;;  %1360 = vmatmul.mubr.msk.bf16.gmra.mxu1 %vm396_vm2, %v1410_v32 }
  0x4d   : > { %1335 = vmatprep.mubr.msk.bf16.mxu0 %vm396_vm2, %v1411_v33 }
  0x54   : > { %1336 = vmatmul.mubr.msk.bf16.gmra.mxu0 %vm396_vm2, %v1412_v34 }
  0xe4   : > { %v1313_v35 = vpop.f32.mrf.mxu0  ;;  %v1341_v36 = vpop.f32.mrf.mxu1 }
  0xe5   : > { %726 = vst.msk [vmem:[#allocation2 + $0x10] sm:$0xff] %vm723_vm3, %v1313_v35  ;;  %754 = vst.msk [vmem:[#allocation2 + $0xf0] sm:$0xff] %vm723_vm3, %v1341_v36 }
  0xe6   : > { %v516_v37 = vpop.f32.mrf.mxu0  ;;  %v628_v38 = vpop.f32.mrf.mxu1 }
  0xe7   : > { %724 = vst.msk [vmem:[#allocation2] sm:$0xff] %vm723_vm3, %v516_v37  ;;  %752 = vst.msk [vmem:[#allocation2 + $0xe0] sm:$0xff] %vm723_vm3, %v628_v38 }
  0xe8   : > { %v1314_v39 = vpop.f32.mrf.mxu0  ;;  %v1342_v40 = vpop.f32.mrf.mxu1 }
  0xe9   : > { %727 = vst.msk [vmem:[#allocation2 + $0x18] sm:$0xff] %vm723_vm3, %v1314_v39  ;;  %755 = vst.msk [vmem:[#allocation2 + $0xf8] sm:$0xff] %vm723_vm3, %v1342_v40 }
  0xea   : > { %v519_v41 = vpop.f32.mrf.mxu0  ;;  %v631_v42 = vpop.f32.mrf.mxu1 }
  0xeb   : > { %725 = vst.msk [vmem:[#allocation2 + $0x8] sm:$0xff] %vm723_vm3, %v519_v41  ;;  %753 = vst.msk [vmem:[#allocation2 + $0xe8] sm:$0xff] %vm723_vm3, %v631_v42 }
  0xec   : > { %v1317_v43 = vpop.f32.mrf.mxu0  ;;  %v1345_v44 = vpop.f32.mrf.mxu1 }
  0xed   : > { %730 = vst.msk [vmem:[#allocation2 + $0x30] sm:$0xff] %vm723_vm3, %v1317_v43  ;;  %758 = vst.msk [vmem:[#allocation2 + $0x110] sm:$0xff] %vm723_vm3, %v1345_v44 }
  0xee   : > { %v532_v45 = vpop.f32.mrf.mxu0  ;;  %v644_v46 = vpop.f32.mrf.mxu1 }
  0xef   : > { %728 = vst.msk [vmem:[#allocation2 + $0x20] sm:$0xff] %vm723_vm3, %v532_v45  ;;  %756 = vst.msk [vmem:[#allocation2 + $0x100] sm:$0xff] %vm723_vm3, %v644_v46 }
  0xf0   : > { %v778_v48 = vld [vmem:[#allocation2 + $0x10] ss:$2 sm:$0xff]  ;;  %v830_v49 = vld [vmem:[#allocation2 + $0x11] ss:$2 sm:$0xff]  ;;  %v1318_v51 = vpop.f32.mrf.mxu0  ;;  %v1346_v52 = vpop.f32.mrf.mxu1 }
  0xf1   : > { %v806_v50 = vld [vmem:[#allocation2 + $0xf0] ss:$2 sm:$0xff]  ;;  %v880_v53 = vmax.f32 %v778_v48, %v830_v49  ;;  %v858_v54 = vld [vmem:[#allocation2 + $0xf1] ss:$2 sm:$0xff]  ;;  %731 = vst.msk [vmem:[#allocation2 + $0x38] sm:$0xff] %vm723_vm3, %v1318_v51  ;;  %759 = vst.msk [vmem:[#allocation2 + $0x118] sm:$0xff] %vm723_vm3, %v1346_v52 }
  0xf2   : > { %v776_v55 = vld [vmem:[#allocation2] ss:$2 sm:$0xff]  ;;  %v828_v56 = vld [vmem:[#allocation2 + $0x1] ss:$2 sm:$0xff]  ;;  %v894_v57 = vmax.f32 %v806_v50, %v858_v54  ;;  %v535_v59 = vpop.f32.mrf.mxu0  ;;  %v647_v60 = vpop.f32.mrf.mxu1 }
  0xf3   : > { %v804_v58 = vld [vmem:[#allocation2 + $0xe0] ss:$2 sm:$0xff]  ;;  %v913_v61 = vadd.f32 %v1541_v47, %v880_v53  ;;  %v879_v62 = vmax.f32 %v776_v55, %v828_v56  ;;  %v856_v63 = vld [vmem:[#allocation2 + $0xe1] ss:$2 sm:$0xff]  ;;  %729 = vst.msk [vmem:[#allocation2 + $0x28] sm:$0xff] %vm723_vm3, %v535_v59  ;;  %757 = vst.msk [vmem:[#allocation2 + $0x108] sm:$0xff] %vm723_vm3, %v647_v60 }
  0xf4   : > { %v927_v0 = vadd.f32 %v1541_v47, %v894_v57  ;;  %v893_v1 = vmax.f32 %v804_v58, %v856_v63  ;;  %v1321_v2 = vpop.f32.mrf.mxu0  ;;  %v1349_v3 = vpop.f32.mrf.mxu1 }
  0xf5   : > { %v939_v4 = vmax.f32 %v913_v61, 0.0  ;;  %v912_v5 = vadd.f32 %v1541_v47, %v879_v62  ;;  %734 = vst.msk [vmem:[#allocation2 + $0x50] sm:$0xff] %vm723_vm3, %v1321_v2  ;;  %762 = vst.msk [vmem:[#allocation2 + $0x130] sm:$0xff] %vm723_vm3, %v1349_v3 }
  0xf6   : > { %v953_v6 = vmax.f32 %v927_v0, 0.0  ;;  %v926_v7 = vadd.f32 %v1541_v47, %v893_v1  ;;  %v548_v8 = vpop.f32.mrf.mxu0  ;;  %v660_v9 = vpop.f32.mrf.mxu1 }
  0xf7   : > { %v1245_v10 = vpack.c.bf16 %v939_v4, %v939_v4  ;;  %v938_v11 = vmax.f32 %v912_v5, 0.0  ;;  %732 = vst.msk [vmem:[#allocation2 + $0x40] sm:$0xff] %vm723_vm3, %v548_v8  ;;  %760 = vst.msk [vmem:[#allocation2 + $0x120] sm:$0xff] %vm723_vm3, %v660_v9 }
  0xf8   : > { %v1259_v12 = vpack.c.bf16 %v953_v6, %v953_v6  ;;  %v952_v13 = vmax.f32 %v926_v7, 0.0  ;;  %v782_v14 = vld [vmem:[#allocation2 + $0x30] ss:$2 sm:$0xff]  ;;  %v834_v15 = vld [vmem:[#allocation2 + $0x31] ss:$2 sm:$0xff]  ;;  %v1322_v16 = vpop.f32.mrf.mxu0  ;;  %v1350_v17 = vpop.f32.mrf.mxu1 }
  0xf9   : > { %1070 = vst.msk [vmem:[%s1558_s8 + $0x4] sm:$0xf] %vm1068_vm4, %v1245_v10  ;;  %v1244_v18 = vpack.c.bf16 %v938_v11, %v938_v11  ;;  %v882_v19 = vmax.f32 %v782_v14, %v834_v15  ;;  %v810_v20 = vld [vmem:[#allocation2 + $0x110] ss:$2 sm:$0xff]  ;;  %v862_v21 = vld [vmem:[#allocation2 + $0x111] ss:$2 sm:$0xff] }
  0xfa   : > { %735 = vst.msk [vmem:[#allocation2 + $0x58] sm:$0xff] %vm723_vm3, %v1322_v16  ;;  %763 = vst.msk [vmem:[#allocation2 + $0x138] sm:$0xff] %vm723_vm3, %v1350_v17  ;;  %v1258_v22 = vpack.c.bf16 %v952_v13, %v952_v13  ;;  %v780_v23 = vld [vmem:[#allocation2 + $0x20] ss:$2 sm:$0xff]  ;;  %v832_v24 = vld [vmem:[#allocation2 + $0x21] ss:$2 sm:$0xff]  ;;  %v896_v25 = vmax.f32 %v810_v20, %v862_v21  ;;  %v551_v27 = vpop.f32.mrf.mxu0  ;;  %v663_v28 = vpop.f32.mrf.mxu1 }
  0xfb   : > { %1084 = vst.msk [vmem:[%s1558_s8 + $0x3c] sm:$0xf] %vm1068_vm4, %v1259_v12  ;;  %v808_v26 = vld [vmem:[#allocation2 + $0x100] ss:$2 sm:$0xff]  ;;  %1069 = vst.msk [vmem:[%s1558_s8] sm:$0xf] %vm1068_vm4, %v1244_v18  ;;  %v915_v29 = vadd.f32 %v1541_v47, %v882_v19  ;;  %v881_v30 = vmax.f32 %v780_v23, %v832_v24 }
  0xfc   : > { %v860_v31 = vld [vmem:[#allocation2 + $0x101] ss:$2 sm:$0xff]  ;;  %733 = vst.msk [vmem:[#allocation2 + $0x48] sm:$0xff] %vm723_vm3, %v551_v27  ;;  %761 = vst.msk [vmem:[#allocation2 + $0x128] sm:$0xff] %vm723_vm3, %v663_v28  ;;  %v929_v32 = vadd.f32 %v1541_v47, %v896_v25  ;;  %v1325_v34 = vpop.f32.mrf.mxu0  ;;  %v1353_v35 = vpop.f32.mrf.mxu1 }
  0xfd   : > { %1083 = vst.msk [vmem:[%s1558_s8 + $0x38] sm:$0xf] %vm1068_vm4, %v1258_v22  ;;  %v895_v33 = vmax.f32 %v808_v26, %v860_v31  ;;  %v941_v36 = vmax.f32 %v915_v29, 0.0  ;;  %v914_v37 = vadd.f32 %v1541_v47, %v881_v30 }
  0xfe   : > { %738 = vst.msk [vmem:[#allocation2 + $0x70] sm:$0xff] %vm723_vm3, %v1325_v34  ;;  %766 = vst.msk [vmem:[#allocation2 + $0x150] sm:$0xff] %vm723_vm3, %v1353_v35  ;;  %v955_v38 = vmax.f32 %v929_v32, 0.0  ;;  %v564_v40 = vpop.f32.mrf.mxu0  ;;  %v676_v41 = vpop.f32.mrf.mxu1 }
  0xff   : > { %v928_v39 = vadd.f32 %v1541_v47, %v895_v33  ;;  %v1247_v42 = vpack.c.bf16 %v941_v36, %v941_v36  ;;  %v940_v43 = vmax.f32 %v914_v37, 0.0  ;;  %736 = vst.msk [vmem:[#allocation2 + $0x60] sm:$0xff] %vm723_vm3, %v564_v40  ;;  %764 = vst.msk [vmem:[#allocation2 + $0x140] sm:$0xff] %vm723_vm3, %v676_v41 }
 0x100   : > { %v1261_v44 = vpack.c.bf16 %v955_v38, %v955_v38  ;;  %v1326_v49 = vpop.f32.mrf.mxu0  ;;  %v1354_v50 = vpop.f32.mrf.mxu1 }
 0x101   : > { %v954_v45 = vmax.f32 %v928_v39, 0.0  ;;  %v786_v46 = vld [vmem:[#allocation2 + $0x50] ss:$2 sm:$0xff]  ;;  %v838_v48 = vld [vmem:[#allocation2 + $0x51] ss:$2 sm:$0xff]  ;;  %v1246_v51 = vpack.c.bf16 %v940_v43, %v940_v43  ;;  %739 = vst.msk [vmem:[#allocation2 + $0x78] sm:$0xff] %vm723_vm3, %v1326_v49 }
 0x102   : > { %1072 = vst.msk [vmem:[%s1558_s8 + $0xc] sm:$0xf] %vm1068_vm4, %v1247_v42  ;;  %v884_v52 = vmax.f32 %v786_v46, %v838_v48  ;;  %v814_v53 = vld [vmem:[#allocation2 + $0x130] ss:$2 sm:$0xff]  ;;  %v866_v54 = vld [vmem:[#allocation2 + $0x131] ss:$2 sm:$0xff]  ;;  %v567_v60 = vpop.f32.mrf.mxu0  ;;  %v679_v61 = vpop.f32.mrf.mxu1 }
 0x103   : > { %767 = vst.msk [vmem:[#allocation2 + $0x158] sm:$0xff] %vm723_vm3, %v1354_v50  ;;  %v1260_v55 = vpack.c.bf16 %v954_v45, %v954_v45  ;;  %v784_v56 = vld [vmem:[#allocation2 + $0x40] ss:$2 sm:$0xff]  ;;  %v836_v57 = vld [vmem:[#allocation2 + $0x41] ss:$2 sm:$0xff]  ;;  %v898_v58 = vmax.f32 %v814_v53, %v866_v54  ;;  %737 = vst.msk [vmem:[#allocation2 + $0x68] sm:$0xff] %vm723_vm3, %v567_v60 }
 0x104   : > { %1086 = vst.msk [vmem:[%s1558_s8 + $0x44] sm:$0xf] %vm1068_vm4, %v1261_v44  ;;  %v812_v59 = vld [vmem:[#allocation2 + $0x120] ss:$2 sm:$0xff]  ;;  %1071 = vst.msk [vmem:[%s1558_s8 + $0x8] sm:$0xf] %vm1068_vm4, %v1246_v51  ;;  %v917_v62 = vadd.f32 %v1541_v47, %v884_v52  ;;  %v883_v63 = vmax.f32 %v784_v56, %v836_v57  ;;  %v1329_v3 = vpop.f32.mrf.mxu0  ;;  %v1357_v4 = vpop.f32.mrf.mxu1 }
 0x105   : > { %v864_v0 = vld [vmem:[#allocation2 + $0x121] ss:$2 sm:$0xff]  ;;  %765 = vst.msk [vmem:[#allocation2 + $0x148] sm:$0xff] %vm723_vm3, %v679_v61  ;;  %v931_v1 = vadd.f32 %v1541_v47, %v898_v58  ;;  %742 = vst.msk [vmem:[#allocation2 + $0x90] sm:$0xff] %vm723_vm3, %v1329_v3 }
 0x106   : > { %1085 = vst.msk [vmem:[%s1558_s8 + $0x40] sm:$0xf] %vm1068_vm4, %v1260_v55  ;;  %v897_v2 = vmax.f32 %v812_v59, %v864_v0  ;;  %v943_v5 = vmax.f32 %v917_v62, 0.0  ;;  %v916_v6 = vadd.f32 %v1541_v47, %v883_v63  ;;  %v580_v9 = vpop.f32.mrf.mxu0  ;;  %v692_v10 = vpop.f32.mrf.mxu1 }
 0x107   : > { %770 = vst.msk [vmem:[#allocation2 + $0x170] sm:$0xff] %vm723_vm3, %v1357_v4  ;;  %v957_v7 = vmax.f32 %v931_v1, 0.0  ;;  %740 = vst.msk [vmem:[#allocation2 + $0x80] sm:$0xff] %vm723_vm3, %v580_v9 }
 0x108   : > { %v930_v8 = vadd.f32 %v1541_v47, %v897_v2  ;;  %v1249_v11 = vpack.c.bf16 %v943_v5, %v943_v5  ;;  %v942_v12 = vmax.f32 %v916_v6, 0.0  ;;  %768 = vst.msk [vmem:[#allocation2 + $0x160] sm:$0xff] %vm723_vm3, %v692_v10  ;;  %v790_v15 = vld [vmem:[#allocation2 + $0x70] ss:$2 sm:$0xff]  ;;  %v842_v16 = vld [vmem:[#allocation2 + $0x71] ss:$2 sm:$0xff]  ;;  %v1330_v17 = vpop.f32.mrf.mxu0  ;;  %v1358_v18 = vpop.f32.mrf.mxu1 }
 0x109   : > { %v1263_v13 = vpack.c.bf16 %v957_v7, %v957_v7  ;;  %v886_v20 = vmax.f32 %v790_v15, %v842_v16  ;;  %743 = vst.msk [vmem:[#allocation2 + $0x98] sm:$0xff] %vm723_vm3, %v1330_v17  ;;  %771 = vst.msk [vmem:[#allocation2 + $0x178] sm:$0xff] %vm723_vm3, %v1358_v18 }
 0x10a   : > { %v956_v14 = vmax.f32 %v930_v8, 0.0  ;;  %1074 = vst.msk [vmem:[%s1558_s8 + $0x14] sm:$0xf] %vm1068_vm4, %v1249_v11  ;;  %v1248_v19 = vpack.c.bf16 %v942_v12, %v942_v12  ;;  %v818_v21 = vld [vmem:[#allocation2 + $0x150] ss:$2 sm:$0xff]  ;;  %v583_v28 = vpop.f32.mrf.mxu0  ;;  %v695_v29 = vpop.f32.mrf.mxu1 }
 0x10b   : > { %v870_v22 = vld [vmem:[#allocation2 + $0x151] ss:$2 sm:$0xff]  ;;  %1088 = vst.msk [vmem:[%s1558_s8 + $0x4c] sm:$0xf] %vm1068_vm4, %v1263_v13  ;;  %v788_v24 = vld [vmem:[#allocation2 + $0x60] ss:$2 sm:$0xff]  ;;  %v919_v30 = vadd.f32 %v1541_v47, %v886_v20 }
 0x10c   : > { %v1262_v23 = vpack.c.bf16 %v956_v14, %v956_v14  ;;  %v840_v25 = vld [vmem:[#allocation2 + $0x61] ss:$2 sm:$0xff]  ;;  %v900_v26 = vmax.f32 %v818_v21, %v870_v22  ;;  %v816_v27 = vld [vmem:[#allocation2 + $0x140] ss:$2 sm:$0xff]  ;;  %1073 = vst.msk [vmem:[%s1558_s8 + $0x10] sm:$0xf] %vm1068_vm4, %v1248_v19  ;;  %v1333_v35 = vpop.f32.mrf.mxu0  ;;  %v1361_v36 = vpop.f32.mrf.mxu1 }
 0x10d   : > { %v885_v31 = vmax.f32 %v788_v24, %v840_v25  ;;  %v868_v32 = vld [vmem:[#allocation2 + $0x141] ss:$2 sm:$0xff]  ;;  %741 = vst.msk [vmem:[#allocation2 + $0x88] sm:$0xff] %vm723_vm3, %v583_v28  ;;  %769 = vst.msk [vmem:[#allocation2 + $0x168] sm:$0xff] %vm723_vm3, %v695_v29  ;;  %v945_v37 = vmax.f32 %v919_v30, 0.0 }
 0x10e   : > { %1087 = vst.msk [vmem:[%s1558_s8 + $0x48] sm:$0xf] %vm1068_vm4, %v1262_v23  ;;  %v933_v33 = vadd.f32 %v1541_v47, %v900_v26  ;;  %v899_v34 = vmax.f32 %v816_v27, %v868_v32  ;;  %v596_v41 = vpop.f32.mrf.mxu0  ;;  %v708_v42 = vpop.f32.mrf.mxu1 }
 0x10f   : > { %v918_v38 = vadd.f32 %v1541_v47, %v885_v31  ;;  %746 = vst.msk [vmem:[#allocation2 + $0xb0] sm:$0xff] %vm723_vm3, %v1333_v35  ;;  %774 = vst.msk [vmem:[#allocation2 + $0x190] sm:$0xff] %vm723_vm3, %v1361_v36  ;;  %v1251_v43 = vpack.c.bf16 %v945_v37, %v945_v37 }
 0x110   : > { %v959_v39 = vmax.f32 %v933_v33, 0.0  ;;  %v932_v40 = vadd.f32 %v1541_v47, %v899_v34  ;;  %744 = vst.msk [vmem:[#allocation2 + $0xa0] sm:$0xff] %vm723_vm3, %v596_v41  ;;  %772 = vst.msk [vmem:[#allocation2 + $0x180] sm:$0xff] %vm723_vm3, %v708_v42  ;;  %v794_v48 = vld [vmem:[#allocation2 + $0x90] ss:$2 sm:$0xff]  ;;  %v1334_v50 = vpop.f32.mrf.mxu0  ;;  %v1362_v51 = vpop.f32.mrf.mxu1 }
 0x111   : > { %v944_v44 = vmax.f32 %v918_v38, 0.0  ;;  %v846_v49 = vld [vmem:[#allocation2 + $0x91] ss:$2 sm:$0xff]  ;;  %1076 = vst.msk [vmem:[%s1558_s8 + $0x1c] sm:$0xf] %vm1068_vm4, %v1251_v43 }
 0x112   : > { %v1265_v45 = vpack.c.bf16 %v959_v39, %v959_v39  ;;  %v958_v46 = vmax.f32 %v932_v40, 0.0  ;;  %v888_v53 = vmax.f32 %v794_v48, %v846_v49  ;;  %v822_v54 = vld [vmem:[#allocation2 + $0x170] ss:$2 sm:$0xff]  ;;  %v874_v55 = vld [vmem:[#allocation2 + $0x171] ss:$2 sm:$0xff]  ;;  %747 = vst.msk [vmem:[#allocation2 + $0xb8] sm:$0xff] %vm723_vm3, %v1334_v50  ;;  %v599_v61 = vpop.f32.mrf.mxu0  ;;  %v711_v62 = vpop.f32.mrf.mxu1 }
 0x113   : > { %v1250_v52 = vpack.c.bf16 %v944_v44, %v944_v44  ;;  %775 = vst.msk [vmem:[#allocation2 + $0x198] sm:$0xff] %vm723_vm3, %v1362_v51  ;;  %v902_v59 = vmax.f32 %v822_v54, %v874_v55  ;;  %745 = vst.msk [vmem:[#allocation2 + $0xa8] sm:$0xff] %vm723_vm3, %v599_v61 }
 0x114   : > { %1090 = vst.msk [vmem:[%s1558_s8 + $0x54] sm:$0xf] %vm1068_vm4, %v1265_v45  ;;  %v1264_v56 = vpack.c.bf16 %v958_v46, %v958_v46  ;;  %v792_v57 = vld [vmem:[#allocation2 + $0x80] ss:$2 sm:$0xff]  ;;  %v844_v58 = vld [vmem:[#allocation2 + $0x81] ss:$2 sm:$0xff]  ;;  %v921_v63 = vadd.f32 %v1541_v47, %v888_v53  ;;  %v1337_v4 = vpop.f32.mrf.mxu0 }
 0x115   : > { %v820_v60 = vld [vmem:[#allocation2 + $0x160] ss:$2 sm:$0xff]  ;;  %1075 = vst.msk [vmem:[%s1558_s8 + $0x18] sm:$0xf] %vm1068_vm4, %v1250_v52  ;;  %v887_v0 = vmax.f32 %v792_v57, %v844_v58  ;;  %v872_v1 = vld [vmem:[#allocation2 + $0x161] ss:$2 sm:$0xff]  ;;  %v935_v2 = vadd.f32 %v1541_v47, %v902_v59 }
 0x116   : > { %773 = vst.msk [vmem:[#allocation2 + $0x188] sm:$0xff] %vm723_vm3, %v711_v62  ;;  %v901_v3 = vmax.f32 %v820_v60, %v872_v1  ;;  %v947_v5 = vmax.f32 %v921_v63, 0.0  ;;  %750 = vst.msk [vmem:[#allocation2 + $0xd0] sm:$0xff] %vm723_vm3, %v1337_v4  ;;  %v612_v9 = vpop.f32.mrf.mxu0 }
 0x117   : > { %1089 = vst.msk [vmem:[%s1558_s8 + $0x50] sm:$0xf] %vm1068_vm4, %v1264_v56  ;;  %v920_v6 = vadd.f32 %v1541_v47, %v887_v0  ;;  %v961_v7 = vmax.f32 %v935_v2, 0.0 }
 0x118   : > { %v934_v8 = vadd.f32 %v1541_v47, %v901_v3  ;;  %v1253_v10 = vpack.c.bf16 %v947_v5, %v947_v5  ;;  %748 = vst.msk [vmem:[#allocation2 + $0xc0] sm:$0xff] %vm723_vm3, %v612_v9  ;;  %v1338_v16 = vpop.f32.mrf.mxu0 }
 0x119   : > { %v946_v11 = vmax.f32 %v920_v6, 0.0  ;;  %v1267_v12 = vpack.c.bf16 %v961_v7, %v961_v7  ;;  %v798_v14 = vld [vmem:[#allocation2 + $0xb0] ss:$2 sm:$0xff]  ;;  %v850_v15 = vld [vmem:[#allocation2 + $0xb1] ss:$2 sm:$0xff]  ;;  %751 = vst.msk [vmem:[#allocation2 + $0xd8] sm:$0xff] %vm723_vm3, %v1338_v16 }
 0x11a   : > { %v960_v13 = vmax.f32 %v934_v8, 0.0  ;;  %1078 = vst.msk [vmem:[%s1558_s8 + $0x24] sm:$0xf] %vm1068_vm4, %v1253_v10  ;;  %v890_v18 = vmax.f32 %v798_v14, %v850_v15  ;;  %v826_v19 = vld [vmem:[#allocation2 + $0x190] ss:$2 sm:$0xff]  ;;  %v615_v26 = vpop.f32.mrf.mxu0 }
 0x11b   : > { %v1252_v17 = vpack.c.bf16 %v946_v11, %v946_v11  ;;  %v878_v20 = vld [vmem:[#allocation2 + $0x191] ss:$2 sm:$0xff]  ;;  %1092 = vst.msk [vmem:[%s1558_s8 + $0x5c] sm:$0xf] %vm1068_vm4, %v1267_v12  ;;  %v796_v22 = vld [vmem:[#allocation2 + $0xa0] ss:$2 sm:$0xff] }
 0x11c   : > { %v1266_v21 = vpack.c.bf16 %v960_v13, %v960_v13  ;;  %v848_v23 = vld [vmem:[#allocation2 + $0xa1] ss:$2 sm:$0xff]  ;;  %v904_v24 = vmax.f32 %v826_v19, %v878_v20  ;;  %v923_v27 = vadd.f32 %v1541_v47, %v890_v18  ;;  %749 = vst.msk [vmem:[#allocation2 + $0xc8] sm:$0xff] %vm723_vm3, %v615_v26 }
 0x11d   : > { %v824_v25 = vld [vmem:[#allocation2 + $0x180] ss:$2 sm:$0xff]  ;;  %1077 = vst.msk [vmem:[%s1558_s8 + $0x20] sm:$0xf] %vm1068_vm4, %v1252_v17  ;;  %v889_v28 = vmax.f32 %v796_v22, %v848_v23  ;;  %v876_v29 = vld [vmem:[#allocation2 + $0x181] ss:$2 sm:$0xff] }
 0x11e   : > { %1091 = vst.msk [vmem:[%s1558_s8 + $0x58] sm:$0xf] %vm1068_vm4, %v1266_v21  ;;  %v937_v30 = vadd.f32 %v1541_v47, %v904_v24  ;;  %v903_v31 = vmax.f32 %v824_v25, %v876_v29  ;;  %v949_v32 = vmax.f32 %v923_v27, 0.0 }
 0x11f   : > { %v922_v33 = vadd.f32 %v1541_v47, %v889_v28 }
 0x120   : > { %v963_v34 = vmax.f32 %v937_v30, 0.0  ;;  %v936_v35 = vadd.f32 %v1541_v47, %v903_v31  ;;  %v1255_v36 = vpack.c.bf16 %v949_v32, %v949_v32  ;;  %v802_v40 = vld [vmem:[#allocation2 + $0xd0] ss:$2 sm:$0xff]  ;;  %v854_v41 = vld [vmem:[#allocation2 + $0xd1] ss:$2 sm:$0xff] }
 0x121   : > { %v948_v37 = vmax.f32 %v922_v33, 0.0  ;;  %v892_v43 = vmax.f32 %v802_v40, %v854_v41 }
 0x122   : > { %v1269_v38 = vpack.c.bf16 %v963_v34, %v963_v34  ;;  %v962_v39 = vmax.f32 %v936_v35, 0.0  ;;  %1080 = vst.msk [vmem:[%s1558_s8 + $0x2c] sm:$0xf] %vm1068_vm4, %v1255_v36 }
 0x123   : > { %v1254_v42 = vpack.c.bf16 %v948_v37, %v948_v37  ;;  %v800_v45 = vld [vmem:[#allocation2 + $0xc0] ss:$2 sm:$0xff]  ;;  %v852_v46 = vld [vmem:[#allocation2 + $0xc1] ss:$2 sm:$0xff]  ;;  %v925_v48 = vadd.f32 %v1541_v47, %v892_v43 }
 0x124   : > { %1094 = vst.msk [vmem:[%s1558_s8 + $0x64] sm:$0xf] %vm1068_vm4, %v1269_v38  ;;  %v1268_v44 = vpack.c.bf16 %v962_v39, %v962_v39  ;;  %v891_v49 = vmax.f32 %v800_v45, %v852_v46 }
 0x125   : > { %1079 = vst.msk [vmem:[%s1558_s8 + $0x28] sm:$0xf] %vm1068_vm4, %v1254_v42  ;;  %v951_v50 = vmax.f32 %v925_v48, 0.0 }
 0x126   : > { %1093 = vst.msk [vmem:[%s1558_s8 + $0x60] sm:$0xf] %vm1068_vm4, %v1268_v44  ;;  %v924_v51 = vadd.f32 %v1541_v47, %v891_v49 }
 0x127   : > { %v1257_v52 = vpack.c.bf16 %v951_v50, %v951_v50 }
 0x128   : > { %v950_v53 = vmax.f32 %v924_v51, 0.0 }
 0x129   : > { %1082 = vst.msk [vmem:[%s1558_s8 + $0x34] sm:$0xf] %vm1068_vm4, %v1257_v52 }
 0x12a   : > { %v1256_v54 = vpack.c.bf16 %v950_v53, %v950_v53 }
 0x12c   : > { %1081 = vst.msk [vmem:[%s1558_s8 + $0x30] sm:$0xf] %vm1068_vm4, %v1256_v54 }
 0x12d PF: > { %s13_s12 = sadd.s32 1, %s1419_s12  }
 0x12e   : > { %p10_p5 = scmp.ge.s32.totalorder %s13_s12, 6  }
 0x130   :  { %12 = sbr.rel (!%p10_p5) target bundleno = 1 (0x1), region = 113 }

// kernel: cnnet_forward.4
= control target key start
LH: loop header
LB: loop body
LE: loop exit
PB: predicated region body
PF: predicated region fallthrough
CT: control target
= control target key end

     0   :  { %s1227_s12 = smov 0   ;;  %s1421_s0 = inlined_call_operand.vmem [shape: bf16[512,400], index: 0, kind: input, shape index: {}]   ;;  %s1422_s1 = inlined_call_operand.vmem [shape: bf16[400,32], index: 1, kind: input, shape index: {}]   ;;  %s1423_s2 = inlined_call_operand.vmem [shape: f32[1,32], index: 2, kind: input, shape index: {}]   ;;  %s1424_s3 = inlined_call_operand.vmem [shape: bf16[256,32], index: 3, kind: output, shape index: {}]  }
   0x1 LB: > { %s957_s13 = sadd.s32 4294967295, %s1204_s12   ;;  %p961_p0 = scmp.ge.s32.totalorder %s1204_s12, 1  ;;  %s1204_s12 = sphi %s1227_s12, %s13_s12  }
   0x2   : > { %p139_p1 = scmp.lt.s32.totalorder %s1204_s12, 5 }
   0x4   : > { %p140_p2 = pnand %p961_p0, %p139_p1 }
   0x5   : > { %s962_s5 = sshll.u32 (!%p140_p2), %s957_s13, 4  ;;  %s965_s19 = sshll.u32 (!%p140_p2), %s957_s13, 3 }
   0x6   : > { %143 = sbr.rel (%p140_p2) target bundleno = 322 (0x142), region = 32  ;;  %p165_p3 = scmp.lt.s32.totalorder (!%p140_p2), %s962_s5, 63 }
   0x7   : > { %p172_p4 = scmp.lt.s32.totalorder (!%p140_p2), %s965_s19, 31 }
   0xb   : > { %v1125_v0 = vld [vmem:[%s1422_s1 + $0x78] sm:$0xff]   ;;  %v1206_v1 = vmov 0   ;;  %v1128_v4 = vld [vmem:[%s1422_s1 + $0x70] sm:$0xff]   ;;  %v1131_v7 = vld [vmem:[%s1422_s1 + $0x68] sm:$0xff]   ;;  %s1426_s5 = smov (!%p165_p3, %s962_s5), 63  ;;  %vm562_vm0 = vcmask 130048  }
   0xc   : > { %684 = vmatprep.subr.bf16.mxu1 %v1206_v1  ;;  %v1126_v2 = vld [vmem:[%s1422_s1 + $0xb8] sm:$0xff]   ;;  %1052 = vmatprep.subr.bf16.mxu0 %v1125_v0  ;;  %v1129_v5 = vld [vmem:[%s1422_s1 + $0xb0] sm:$0xff]   ;;  %v1132_v8 = vld [vmem:[%s1422_s1 + $0xa8] sm:$0xff]   ;;  %s1043_s24 = sshll.u32 %s1426_s5, 4  ;;  %vm781_vm1 = vcmask 261120   ;;  %s1428_s19 = smov (!%p172_p4, %s965_s19), 31 }
   0xd   : > { %v1127_v3 = vld [vmem:[%s1422_s1 + $0x38] sm:$0xff]   ;;  %685 = vmatpush1.bf16.msra.mxu1 %v1126_v2  ;;  %v1130_v6 = vld [vmem:[%s1422_s1 + $0x30] sm:$0xff]   ;;  %v1133_v9 = vld [vmem:[%s1422_s1 + $0x28] sm:$0xff]   ;;  %s1306_s5 = scalar_lea.vmem %s1421_s0, %s1043_s24  ;;  %s966_s21 = sshll.u32 %s1428_s19, 2  ;;  %vm892_vm2 = vcmask 257024  }
   0xe   : > { %1053 = vmatpush3.bf16.msra.mxu0 %v1127_v3  ;;  %686 = vmatprep.subr.bf16.mxu1 %v1206_v1  ;;  %v1134_v10 = vld [vmem:[%s1422_s1 + $0x60] sm:$0xff]   ;;  %v1137_v13 = vld [vmem:[%s1422_s1 + $0x58] sm:$0xff]   ;;  %v1140_v16 = vld [vmem:[%s1422_s1 + $0x50] sm:$0xff]   ;;  %s1382_s24 = scalar_lea.vmem %s1424_s3, %s966_s21 }
   0xf   : > { %1054 = vmatprep.subr.bf16.mxu0 %v1128_v4  ;;  %v1135_v11 = vld [vmem:[%s1422_s1 + $0xa0] sm:$0xff]   ;;  %v1138_v14 = vld [vmem:[%s1422_s1 + $0x98] sm:$0xff]   ;;  %v1141_v17 = vld [vmem:[%s1422_s1 + $0x90] sm:$0xff]  }
  0x10   : > { %v1136_v12 = vld [vmem:[%s1422_s1 + $0x20] sm:$0xff]   ;;  %v1139_v15 = vld [vmem:[%s1422_s1 + $0x18] sm:$0xff]   ;;  %v1142_v18 = vld [vmem:[%s1422_s1 + $0x10] sm:$0xff]  }
  0x11   : > { %687 = vmatpush1.bf16.msra.mxu1 %v1129_v5  ;;  %v1143_v19 = vld [vmem:[%s1422_s1 + $0x48] sm:$0xff]   ;;  %v1146_v22 = vld [vmem:[%s1422_s1 + $0x40] sm:$0xff]  }
  0x12   : > { %1055 = vmatpush3.bf16.msra.mxu0 %v1130_v6  ;;  %688 = vmatprep.subr.bf16.mxu1 %v1206_v1  ;;  %v1144_v20 = vld [vmem:[%s1422_s1 + $0x88] sm:$0xff]   ;;  %v1151_v23 = vld [vmem:[%s1306_s5 + $0x4] ss:$16 sps:$4 sm:$0xff]   ;;  %v1149_v27 = vld [vmem:[%s1306_s5] ss:$16 sps:$4 sm:$0xff]  }
  0x13   : > { %1056 = vmatprep.subr.bf16.mxu0 %v1131_v7  ;;  %v1145_v21 = vld [vmem:[%s1422_s1 + $0x8] sm:$0xff]   ;;  %v1147_v24 = vld [vmem:[%s1422_s1 + $0x80] sm:$0xff]   ;;  %619 = vmatprep.mubr.bf16.mxu0 %v1151_v23 }
  0x14   : > { %v1155_v25 = vld [vmem:[%s1306_s5 + $0xc] ss:$16 sps:$4 sm:$0xff]   ;;  %v1148_v26 = vld [vmem:[%s1422_s1] sm:$0xff]   ;;  %v1153_v30 = vld [vmem:[%s1306_s5 + $0x8] ss:$16 sps:$4 sm:$0xff]  }
  0x15   : > { %689 = vmatpush1.bf16.msra.mxu1 %v1132_v8  ;;  %1024 = vmatprep.mubr.msk.bf16.mxu1 %vm562_vm0, %v1155_v25  ;;  %v1152_v28 = vld [vmem:[%s1422_s1 + $0xc0] sm:$0xff]   ;;  %v1159_v31 = vld [vmem:[%s1306_s5 + $0x2c] ss:$16 sps:$4 sm:$0xff]   ;;  %v1161_v34 = vld [vmem:[%s1306_s5 + $0x28] ss:$16 sps:$4 sm:$0xff]  }
  0x16   : > { %1057 = vmatpush3.bf16.msra.mxu0 %v1133_v9  ;;  %690 = vmatprep.subr.bf16.mxu1 %v1206_v1  ;;  %v1156_v29 = vld [vmem:[%s1306_s5 + $0x24] ss:$16 sps:$4 sm:$0xff]   ;;  %v1158_v32 = vld [vmem:[%s1306_s5 + $0x20] ss:$16 sps:$4 sm:$0xff]   ;;  %v1165_v35 = vld [vmem:[%s1306_s5 + $0x4c] ss:$16 sps:$4 sm:$0xff]  }
  0x17   : > { %1058 = vmatprep.subr.bf16.mxu0 %v1134_v10  ;;  %v1162_v33 = vld [vmem:[%s1306_s5 + $0x44] ss:$16 sps:$4 sm:$0xff]   ;;  %v1164_v36 = vld [vmem:[%s1306_s5 + $0x40] ss:$16 sps:$4 sm:$0xff]   ;;  %v1167_v38 = vld [vmem:[%s1306_s5 + $0x48] ss:$16 sps:$4 sm:$0xff]  }
  0x18   : > { %v1168_v37 = vld [vmem:[%s1306_s5 + $0x64] ss:$16 sps:$4 sm:$0xff]   ;;  %v1171_v39 = vld [vmem:[%s1306_s5 + $0x6c] ss:$16 sps:$4 sm:$0xff]   ;;  %v1170_v40 = vld [vmem:[%s1306_s5 + $0x60] ss:$16 sps:$4 sm:$0xff]  }
  0x19   : > { %691 = vmatpush1.bf16.msra.mxu1 %v1135_v11  ;;  %v1174_v41 = vld [vmem:[%s1306_s5 + $0x84] ss:$16 sps:$4 sm:$0xff]   ;;  %v1173_v42 = vld [vmem:[%s1306_s5 + $0x68] ss:$16 sps:$4 sm:$0xff]   ;;  %v1177_v43 = vld [vmem:[%s1306_s5 + $0x8c] ss:$16 sps:$4 sm:$0xff]  }
  0x1a   : > { %1059 = vmatpush3.bf16.msra.mxu0 %v1136_v12  ;;  %692 = vmatprep.subr.bf16.mxu1 %v1206_v1  ;;  %v1176_v44 = vld [vmem:[%s1306_s5 + $0x80] ss:$16 sps:$4 sm:$0xff]   ;;  %v1180_v45 = vld [vmem:[%s1306_s5 + $0xa4] ss:$16 sps:$4 sm:$0xff]   ;;  %v1179_v46 = vld [vmem:[%s1306_s5 + $0x88] ss:$16 sps:$4 sm:$0xff]  }
  0x1b   : > { %1060 = vmatprep.subr.bf16.mxu0 %v1137_v13  ;;  %v1183_v47 = vld [vmem:[%s1306_s5 + $0xac] ss:$16 sps:$4 sm:$0xff]   ;;  %v1182_v48 = vld [vmem:[%s1306_s5 + $0xa0] ss:$16 sps:$4 sm:$0xff]   ;;  %v1186_v49 = vld [vmem:[%s1306_s5 + $0xc4] ss:$16 sps:$4 sm:$0xff]  }
  0x1c   : > { %v1185_v50 = vld [vmem:[%s1306_s5 + $0xa8] ss:$16 sps:$4 sm:$0xff]   ;;  %v1189_v51 = vld [vmem:[%s1306_s5 + $0xcc] ss:$16 sps:$4 sm:$0xff]   ;;  %v1188_v52 = vld [vmem:[%s1306_s5 + $0xc0] ss:$16 sps:$4 sm:$0xff]  }
  0x1d   : > { %693 = vmatpush1.bf16.msra.mxu1 %v1138_v14  ;;  %v1192_v53 = vld [vmem:[%s1306_s5 + $0xe4] ss:$16 sps:$4 sm:$0xff]   ;;  %v1191_v54 = vld [vmem:[%s1306_s5 + $0xc8] ss:$16 sps:$4 sm:$0xff]   ;;  %v1195_v55 = vld [vmem:[%s1306_s5 + $0xec] ss:$16 sps:$4 sm:$0xff]  }
  0x1e   : > { %1061 = vmatpush3.bf16.msra.mxu0 %v1139_v15  ;;  %694 = vmatprep.subr.bf16.mxu1 %v1206_v1  ;;  %v1194_v56 = vld [vmem:[%s1306_s5 + $0xe0] ss:$16 sps:$4 sm:$0xff]   ;;  %v1197_v57 = vld [vmem:[%s1306_s5 + $0xe8] ss:$16 sps:$4 sm:$0xff]  }
  0x1f   : > { %1062 = vmatprep.subr.bf16.mxu0 %v1140_v16 }
  0x21   : > { %695 = vmatpush1.bf16.msra.mxu1 %v1141_v17 }
  0x22   : > { %1063 = vmatpush3.bf16.msra.mxu0 %v1142_v18  ;;  %696 = vmatprep.subr.bf16.mxu1 %v1206_v1 }
  0x23   : > { %1064 = vmatprep.subr.bf16.mxu0 %v1143_v19 }
  0x25   : > { %697 = vmatpush1.bf16.msra.mxu1 %v1144_v20 }
  0x26   : > { %1065 = vmatpush3.bf16.msra.mxu0 %v1145_v21  ;;  %698 = vmatprep.subr.bf16.mxu1 %v1206_v1  ;;  %v1374_v21 = vld [vmem:[%s1423_s2] ss:$0 sm:$0xff] }
  0x27   : > { %1066 = vmatprep.subr.bf16.mxu0 %v1146_v22 }
  0x29   : > { %699 = vmatpush1.bf16.msra.mxu1 %v1147_v24 }
  0x2a   : > { %1067 = vmatpush3.bf16.msra.mxu0 %v1148_v26  ;;  %714 = vmatprep.subr.bf16.mxu1 %v1206_v1 }
  0x2d   : > { %620 = vmatmul.mubr.bf16.vlgmr.msra.gmra.mxu0 %v1149_v27  ;;  %715 = vmatpush2.bf16.msra.mxu1 %v1152_v28 }
  0x2e   : > { %627 = vmatprep.mubr.bf16.mxu0 %v1156_v29 }
  0x30   : > { %717 = vmatmul.mubr.bf16.vlgmr.msra.gmra.mxu1 %v1153_v30 }
  0x31   : > { %1025 = vmatprep.mubr.msk.bf16.mxu1 %vm562_vm0, %v1159_v31 }
  0x35   : > { %628 = vmatmul.mubr.bf16.gmra.mxu0 %v1158_v32 }
  0x36   : > { %635 = vmatprep.mubr.bf16.mxu0 %v1162_v33 }
  0x38   : > { %725 = vmatmul.mubr.bf16.gmra.mxu1 %v1161_v34 }
  0x39   : > { %1026 = vmatprep.mubr.msk.bf16.mxu1 %vm562_vm0, %v1165_v35 }
  0x3d   : > { %636 = vmatmul.mubr.bf16.gmra.mxu0 %v1164_v36 }
  0x3e   : > { %643 = vmatprep.mubr.bf16.mxu0 %v1168_v37 }
  0x40   : > { %733 = vmatmul.mubr.bf16.gmra.mxu1 %v1167_v38 }
  0x41   : > { %1027 = vmatprep.mubr.msk.bf16.mxu1 %vm562_vm0, %v1171_v39 }
  0x45   : > { %644 = vmatmul.mubr.bf16.gmra.mxu0 %v1170_v40 }
  0x46   : > { %651 = vmatprep.mubr.bf16.mxu0 %v1174_v41 }
  0x48   : > { %741 = vmatmul.mubr.bf16.gmra.mxu1 %v1173_v42 }
  0x49   : > { %1028 = vmatprep.mubr.msk.bf16.mxu1 %vm562_vm0, %v1177_v43 }
  0x4d   : > { %652 = vmatmul.mubr.bf16.gmra.mxu0 %v1176_v44 }
  0x4e   : > { %659 = vmatprep.mubr.bf16.mxu0 %v1180_v45 }
  0x50   : > { %749 = vmatmul.mubr.bf16.gmra.mxu1 %v1179_v46 }
  0x51   : > { %1029 = vmatprep.mubr.msk.bf16.mxu1 %vm562_vm0, %v1183_v47 }
  0x55   : > { %660 = vmatmul.mubr.bf16.gmra.mxu0 %v1182_v48 }
  0x56   : > { %667 = vmatprep.mubr.bf16.mxu0 %v1186_v49 }
  0x58   : > { %757 = vmatmul.mubr.bf16.gmra.mxu1 %v1185_v50 }
  0x59   : > { %1030 = vmatprep.mubr.msk.bf16.mxu1 %vm562_vm0, %v1189_v51 }
  0x5d   : > { %668 = vmatmul.mubr.bf16.gmra.mxu0 %v1188_v52 }
  0x5e   : > { %675 = vmatprep.mubr.bf16.mxu0 %v1192_v53 }
  0x60   : > { %765 = vmatmul.mubr.bf16.gmra.mxu1 %v1191_v54 }
  0x61   : > { %1031 = vmatprep.mubr.msk.bf16.mxu1 %vm562_vm0, %v1195_v55 }
  0x65   : > { %676 = vmatmul.mubr.bf16.gmra.mxu0 %v1194_v56 }
  0x68   : > { %773 = vmatmul.mubr.bf16.gmra.mxu1 %v1197_v57 }
  0xed   : > { %v1068_v58 = vpop.f32.mrf.mxu0 }
  0xef   : > { %v1069_v59 = vpop.f32.mrf.mxu0 }
  0xf0   : > { %v1070_v60 = vadd.f32 %v1069_v59, %v1068_v58  ;;  %v718_v61 = vpop.f32.mrf.mxu1 }
  0xf1   : > { %v1071_v62 = vpop.f32.mrf.mxu0 }
  0xf2   : > { %v719_v63 = vadd.f32 %v1070_v60, %v718_v61  ;;  %v720_v0 = vpop.f32.mrf.mxu1 }
  0xf3   : > { %v1072_v1 = vpop.f32.mrf.mxu0 }
  0xf4   : > { %782 = vst.msk [vmem:[#allocation2] sm:$0xff] %vm781_vm1, %v719_v63  ;;  %v1073_v2 = vadd.f32 %v1072_v1, %v1071_v62  ;;  %v721_v3 = vpop.f32.mrf.mxu1 }
  0xf5   : > { %v1074_v4 = vpop.f32.mrf.mxu0 }
  0xf6   : > { %v722_v5 = vadd.f32 %v1073_v2, %v721_v3  ;;  %v723_v6 = vpop.f32.mrf.mxu1 }
  0xf7   : > { %v1075_v7 = vpop.f32.mrf.mxu0 }
  0xf8   : > { %783 = vst.msk [vmem:[#allocation2 + $0x8] sm:$0xff] %vm781_vm1, %v722_v5  ;;  %v1076_v8 = vadd.f32 %v1075_v7, %v1074_v4  ;;  %v726_v9 = vpop.f32.mrf.mxu1 }
  0xf9   : > { %v1077_v10 = vpop.f32.mrf.mxu0 }
  0xfa   : > { %v727_v11 = vadd.f32 %v1076_v8, %v726_v9  ;;  %v728_v12 = vpop.f32.mrf.mxu1 }
  0xfb   : > { %v1078_v13 = vpop.f32.mrf.mxu0 }
  0xfc   : > { %784 = vst.msk [vmem:[#allocation2 + $0x10] sm:$0xff] %vm781_vm1, %v727_v11  ;;  %v1079_v14 = vadd.f32 %v1078_v13, %v1077_v10  ;;  %v729_v15 = vpop.f32.mrf.mxu1 }
  0xfd   : > { %v1080_v16 = vpop.f32.mrf.mxu0 }
  0xfe   : > { %v730_v17 = vadd.f32 %v1079_v14, %v729_v15  ;;  %v731_v18 = vpop.f32.mrf.mxu1 }
  0xff   : > { %v798_v19 = vld [vmem:[#allocation2] ss:$2 sm:$0xff]  ;;  %v814_v20 = vld [vmem:[#allocation2 + $0x1] ss:$2 sm:$0xff]  ;;  %v1081_v22 = vpop.f32.mrf.mxu0 }
 0x100   : > { %v829_v23 = vmax.f32 %v798_v19, %v814_v20  ;;  %785 = vst.msk [vmem:[#allocation2 + $0x18] sm:$0xff] %vm781_vm1, %v730_v17  ;;  %v1082_v24 = vadd.f32 %v1081_v22, %v1080_v16  ;;  %v734_v25 = vpop.f32.mrf.mxu1 }
 0x101   : > { %v1083_v26 = vpop.f32.mrf.mxu0 }
 0x102   : > { %v844_v27 = vadd.f32 %v1374_v21, %v829_v23  ;;  %v735_v28 = vadd.f32 %v1082_v24, %v734_v25  ;;  %v736_v29 = vpop.f32.mrf.mxu1 }
 0x103   : > { %v1084_v30 = vpop.f32.mrf.mxu0 }
 0x104   : > { %v852_v31 = vmax.f32 %v844_v27, 0.0  ;;  %786 = vst.msk [vmem:[#allocation2 + $0x20] sm:$0xff] %vm781_vm1, %v735_v28  ;;  %v1085_v32 = vadd.f32 %v1084_v30, %v1083_v26  ;;  %v737_v33 = vpop.f32.mrf.mxu1 }
 0x105   : > { %v1086_v34 = vpop.f32.mrf.mxu0 }
 0x106   : > { %v1044_v35 = vpack.c.bf16 %v852_v31, %v852_v31  ;;  %v738_v36 = vadd.f32 %v1085_v32, %v737_v33  ;;  %v739_v37 = vpop.f32.mrf.mxu1 }
 0x107   : > { %v800_v38 = vld [vmem:[#allocation2 + $0x10] ss:$2 sm:$0xff]  ;;  %v816_v39 = vld [vmem:[#allocation2 + $0x11] ss:$2 sm:$0xff]  ;;  %v1087_v40 = vpop.f32.mrf.mxu0 }
 0x108   : > { %893 = vst.msk [vmem:[%s1382_s24] sm:$0xf] %vm892_vm2, %v1044_v35  ;;  %v830_v41 = vmax.f32 %v800_v38, %v816_v39  ;;  %v1088_v42 = vadd.f32 %v1087_v40, %v1086_v34  ;;  %v742_v43 = vpop.f32.mrf.mxu1 }
 0x109   : > { %787 = vst.msk [vmem:[#allocation2 + $0x28] sm:$0xff] %vm781_vm1, %v738_v36  ;;  %v1089_v44 = vpop.f32.mrf.mxu0 }
 0x10a   : > { %v845_v45 = vadd.f32 %v1374_v21, %v830_v41  ;;  %v743_v46 = vadd.f32 %v1088_v42, %v742_v43  ;;  %v744_v47 = vpop.f32.mrf.mxu1 }
 0x10b   : > { %v1090_v48 = vpop.f32.mrf.mxu0 }
 0x10c   : > { %v853_v49 = vmax.f32 %v845_v45, 0.0  ;;  %788 = vst.msk [vmem:[#allocation2 + $0x30] sm:$0xff] %vm781_vm1, %v743_v46  ;;  %v1091_v50 = vadd.f32 %v1090_v48, %v1089_v44  ;;  %v745_v51 = vpop.f32.mrf.mxu1 }
 0x10d   : > { %v1092_v52 = vpop.f32.mrf.mxu0 }
 0x10e   : > { %v1045_v53 = vpack.c.bf16 %v853_v49, %v853_v49  ;;  %v746_v54 = vadd.f32 %v1091_v50, %v745_v51  ;;  %v747_v55 = vpop.f32.mrf.mxu1 }
 0x10f   : > { %v1093_v58 = vpop.f32.mrf.mxu0 }
 0x110   : > { %v802_v56 = vld [vmem:[#allocation2 + $0x20] ss:$2 sm:$0xff]  ;;  %v818_v57 = vld [vmem:[#allocation2 + $0x21] ss:$2 sm:$0xff]  ;;  %894 = vst.msk [vmem:[%s1382_s24 + $0x4] sm:$0xf] %vm892_vm2, %v1045_v53  ;;  %v1094_v60 = vadd.f32 %v1093_v58, %v1092_v52  ;;  %v750_v61 = vpop.f32.mrf.mxu1 }
 0x111   : > { %v831_v59 = vmax.f32 %v802_v56, %v818_v57  ;;  %789 = vst.msk [vmem:[#allocation2 + $0x38] sm:$0xff] %vm781_vm1, %v746_v54  ;;  %v1095_v62 = vpop.f32.mrf.mxu0 }
 0x112   : > { %v751_v0 = vadd.f32 %v1094_v60, %v750_v61  ;;  %v752_v1 = vpop.f32.mrf.mxu1 }
 0x113   : > { %v846_v63 = vadd.f32 %v1374_v21, %v831_v59  ;;  %v1096_v2 = vpop.f32.mrf.mxu0 }
 0x114   : > { %790 = vst.msk [vmem:[#allocation2 + $0x40] sm:$0xff] %vm781_vm1, %v751_v0  ;;  %v1097_v4 = vadd.f32 %v1096_v2, %v1095_v62  ;;  %v753_v5 = vpop.f32.mrf.mxu1 }
 0x115   : > { %v854_v3 = vmax.f32 %v846_v63, 0.0  ;;  %v1098_v6 = vpop.f32.mrf.mxu0 }
 0x116   : > { %v754_v8 = vadd.f32 %v1097_v4, %v753_v5  ;;  %v755_v9 = vpop.f32.mrf.mxu1 }
 0x117   : > { %v1046_v7 = vpack.c.bf16 %v854_v3, %v854_v3  ;;  %v1099_v12 = vpop.f32.mrf.mxu0 }
 0x118   : > { %v804_v10 = vld [vmem:[#allocation2 + $0x30] ss:$2 sm:$0xff]  ;;  %v820_v11 = vld [vmem:[#allocation2 + $0x31] ss:$2 sm:$0xff]  ;;  %791 = vst.msk [vmem:[#allocation2 + $0x48] sm:$0xff] %vm781_vm1, %v754_v8  ;;  %v1100_v14 = vadd.f32 %v1099_v12, %v1098_v6  ;;  %v758_v15 = vpop.f32.mrf.mxu1 }
 0x119   : > { %895 = vst.msk [vmem:[%s1382_s24 + $0x8] sm:$0xf] %vm892_vm2, %v1046_v7  ;;  %v832_v13 = vmax.f32 %v804_v10, %v820_v11  ;;  %v1101_v16 = vpop.f32.mrf.mxu0 }
 0x11a   : > { %v759_v18 = vadd.f32 %v1100_v14, %v758_v15  ;;  %v760_v19 = vpop.f32.mrf.mxu1 }
 0x11b   : > { %v847_v17 = vadd.f32 %v1374_v21, %v832_v13  ;;  %v1102_v20 = vpop.f32.mrf.mxu0 }
 0x11c   : > { %792 = vst.msk [vmem:[#allocation2 + $0x50] sm:$0xff] %vm781_vm1, %v759_v18  ;;  %v1103_v23 = vadd.f32 %v1102_v20, %v1101_v16  ;;  %v761_v24 = vpop.f32.mrf.mxu1 }
 0x11d   : > { %v855_v22 = vmax.f32 %v847_v17, 0.0  ;;  %v1104_v25 = vpop.f32.mrf.mxu0 }
 0x11e   : > { %v762_v27 = vadd.f32 %v1103_v23, %v761_v24  ;;  %v763_v28 = vpop.f32.mrf.mxu1 }
 0x11f   : > { %v1047_v26 = vpack.c.bf16 %v855_v22, %v855_v22  ;;  %v806_v29 = vld [vmem:[#allocation2 + $0x40] ss:$2 sm:$0xff]  ;;  %v822_v30 = vld [vmem:[#allocation2 + $0x41] ss:$2 sm:$0xff]  ;;  %v1105_v31 = vpop.f32.mrf.mxu0 }
 0x120   : > { %v833_v32 = vmax.f32 %v806_v29, %v822_v30  ;;  %793 = vst.msk [vmem:[#allocation2 + $0x58] sm:$0xff] %vm781_vm1, %v762_v27  ;;  %v1106_v33 = vadd.f32 %v1105_v31, %v1104_v25  ;;  %v766_v34 = vpop.f32.mrf.mxu1 }
 0x121   : > { %896 = vst.msk [vmem:[%s1382_s24 + $0xc] sm:$0xf] %vm892_vm2, %v1047_v26  ;;  %v1107_v35 = vpop.f32.mrf.mxu0 }
 0x122   : > { %v848_v36 = vadd.f32 %v1374_v21, %v833_v32  ;;  %v767_v37 = vadd.f32 %v1106_v33, %v766_v34  ;;  %v768_v38 = vpop.f32.mrf.mxu1 }
 0x123   : > { %v1108_v39 = vpop.f32.mrf.mxu0 }
 0x124   : > { %v856_v40 = vmax.f32 %v848_v36, 0.0  ;;  %794 = vst.msk [vmem:[#allocation2 + $0x60] sm:$0xff] %vm781_vm1, %v767_v37  ;;  %v1109_v41 = vadd.f32 %v1108_v39, %v1107_v35  ;;  %v769_v42 = vpop.f32.mrf.mxu1 }
 0x125   : > { %v1110_v43 = vpop.f32.mrf.mxu0 }
 0x126   : > { %v1048_v44 = vpack.c.bf16 %v856_v40, %v856_v40  ;;  %v770_v45 = vadd.f32 %v1109_v41, %v769_v42  ;;  %v771_v46 = vpop.f32.mrf.mxu1 }
 0x127   : > { %v808_v47 = vld [vmem:[#allocation2 + $0x50] ss:$2 sm:$0xff]  ;;  %v824_v48 = vld [vmem:[#allocation2 + $0x51] ss:$2 sm:$0xff]  ;;  %v1111_v49 = vpop.f32.mrf.mxu0 }
 0x128   : > { %897 = vst.msk [vmem:[%s1382_s24 + $0x10] sm:$0xf] %vm892_vm2, %v1048_v44  ;;  %v834_v50 = vmax.f32 %v808_v47, %v824_v48  ;;  %v1112_v51 = vadd.f32 %v1111_v49, %v1110_v43  ;;  %v774_v52 = vpop.f32.mrf.mxu1 }
 0x129   : > { %795 = vst.msk [vmem:[#allocation2 + $0x68] sm:$0xff] %vm781_vm1, %v770_v45  ;;  %v1113_v53 = vpop.f32.mrf.mxu0 }
 0x12a   : > { %v849_v54 = vadd.f32 %v1374_v21, %v834_v50  ;;  %v775_v55 = vadd.f32 %v1112_v51, %v774_v52  ;;  %v776_v56 = vpop.f32.mrf.mxu1 }
 0x12b   : > { %v1114_v57 = vpop.f32.mrf.mxu0 }
 0x12c   : > { %v857_v58 = vmax.f32 %v849_v54, 0.0  ;;  %796 = vst.msk [vmem:[#allocation2 + $0x70] sm:$0xff] %vm781_vm1, %v775_v55  ;;  %v1115_v59 = vadd.f32 %v1114_v57, %v1113_v53  ;;  %v777_v60 = vpop.f32.mrf.mxu1 }
 0x12e   : > { %v1049_v61 = vpack.c.bf16 %v857_v58, %v857_v58  ;;  %v778_v62 = vadd.f32 %v1115_v59, %v777_v60  ;;  %v779_v63 = vpop.f32.mrf.mxu1 }
 0x130   : > { %v810_v0 = vld [vmem:[#allocation2 + $0x60] ss:$2 sm:$0xff]  ;;  %v826_v1 = vld [vmem:[#allocation2 + $0x61] ss:$2 sm:$0xff]  ;;  %898 = vst.msk [vmem:[%s1382_s24 + $0x14] sm:$0xf] %vm892_vm2, %v1049_v61 }
 0x131   : > { %v835_v2 = vmax.f32 %v810_v0, %v826_v1  ;;  %797 = vst.msk [vmem:[#allocation2 + $0x78] sm:$0xff] %vm781_vm1, %v778_v62 }
 0x133   : > { %v850_v3 = vadd.f32 %v1374_v21, %v835_v2 }
 0x135   : > { %v858_v4 = vmax.f32 %v850_v3, 0.0 }
 0x137   : > { %v1050_v5 = vpack.c.bf16 %v858_v4, %v858_v4 }
 0x138   : > { %v812_v6 = vld [vmem:[#allocation2 + $0x70] ss:$2 sm:$0xff]  ;;  %v828_v7 = vld [vmem:[#allocation2 + $0x71] ss:$2 sm:$0xff] }
 0x139   : > { %899 = vst.msk [vmem:[%s1382_s24 + $0x18] sm:$0xf] %vm892_vm2, %v1050_v5  ;;  %v836_v8 = vmax.f32 %v812_v6, %v828_v7 }
 0x13b   : > { %v851_v9 = vadd.f32 %v1374_v21, %v836_v8 }
 0x13d   : > { %v859_v10 = vmax.f32 %v851_v9, 0.0 }
 0x13f   : > { %v1051_v11 = vpack.c.bf16 %v859_v10, %v859_v10 }
 0x141   : > { %900 = vst.msk [vmem:[%s1382_s24 + $0x1c] sm:$0xf] %vm892_vm2, %v1051_v11 }
 0x142 PF: > { %s13_s12 = sadd.s32 1, %s1204_s12  }
 0x143   : > { %p10_p5 = scmp.ge.s32.totalorder %s13_s12, 6  }
 0x145   :  { %12 = sbr.rel (!%p10_p5) target bundleno = 1 (0x1), region = 77 }

// kernel: cnnet_forward.5
= control target key start
LH: loop header
LB: loop body
LE: loop exit
PB: predicated region body
PF: predicated region fallthrough
CT: control target
= control target key end

     0   :  { %vm1559_vm0 = vmmov 0   ;;  %vm885_vm1 = vcmask 261120   ;;  %vm1176_vm2 = vcmask 31744   ;;  %s1922_s1 = inlined_call_operand.vmem [shape: bf16[1568,4], index: 1, kind: input, shape index: {}]   ;;  %s1923_s0 = inlined_call_operand.vmem [shape: bf16[16,1568], index: 0, kind: input, shape index: {}]   ;;  %s1924_s2 = inlined_call_operand.vmem [shape: f32[1,4], index: 2, kind: input, shape index: {}]   ;;  %s1925_s3 = inlined_call_operand.vmem [shape: f32[16,4], index: 3, kind: output, shape index: {}]  }
   0x1   :  { %v1441_v0 = vld [vmem:[%s1922_s1 + $0x78] sm:$0xff]   ;;  %v1445_v4 = vld [vmem:[%s1922_s1 + $0x70] sm:$0xff]   ;;  %v1449_v8 = vld [vmem:[%s1922_s1 + $0x68] sm:$0xff]  }
   0x2   :  { %v1442_v1 = vld [vmem:[%s1922_s1 + $0xf8] sm:$0xff]   ;;  %1296 = vmatprep.subr.bf16.mxu0 %v1441_v0  ;;  %v1446_v5 = vld [vmem:[%s1922_s1 + $0xf0] sm:$0xff]   ;;  %v1450_v9 = vld [vmem:[%s1922_s1 + $0xe8] sm:$0xff]  }
   0x3   :  { %v1443_v2 = vld [vmem:[%s1922_s1 + $0x38] sm:$0xff]   ;;  %1318 = vmatprep.subr.bf16.mxu1 %v1442_v1  ;;  %v1447_v6 = vld [vmem:[%s1922_s1 + $0x30] sm:$0xff]   ;;  %v1451_v10 = vld [vmem:[%s1922_s1 + $0x28] sm:$0xff]  }
   0x4   :  { %v1444_v3 = vld [vmem:[%s1922_s1 + $0xb8] sm:$0xff]   ;;  %1297 = vmatpush3.bf16.msra.mxu0 %v1443_v2  ;;  %v1448_v7 = vld [vmem:[%s1922_s1 + $0xb0] sm:$0xff]   ;;  %v1452_v11 = vld [vmem:[%s1922_s1 + $0xa8] sm:$0xff]  }
   0x5   :  { %1319 = vmatpush3.bf16.msra.mxu1 %v1444_v3  ;;  %1298 = vmatprep.subr.bf16.mxu0 %v1445_v4  ;;  %v1453_v12 = vld [vmem:[%s1922_s1 + $0x60] sm:$0xff]   ;;  %v1457_v16 = vld [vmem:[%s1922_s1 + $0x58] sm:$0xff]   ;;  %v1461_v20 = vld [vmem:[%s1922_s1 + $0x50] sm:$0xff]  }
   0x6   :  { %1320 = vmatprep.subr.bf16.mxu1 %v1446_v5  ;;  %v1454_v13 = vld [vmem:[%s1922_s1 + $0xe0] sm:$0xff]   ;;  %v1458_v17 = vld [vmem:[%s1922_s1 + $0xd8] sm:$0xff]   ;;  %v1462_v21 = vld [vmem:[%s1922_s1 + $0xd0] sm:$0xff]  }
   0x7   :  { %v1455_v14 = vld [vmem:[%s1922_s1 + $0x20] sm:$0xff]   ;;  %v1459_v18 = vld [vmem:[%s1922_s1 + $0x18] sm:$0xff]   ;;  %v1463_v22 = vld [vmem:[%s1922_s1 + $0x10] sm:$0xff]  }
   0x8   :  { %1299 = vmatpush3.bf16.msra.mxu0 %v1447_v6  ;;  %v1456_v15 = vld [vmem:[%s1922_s1 + $0xa0] sm:$0xff]   ;;  %v1460_v19 = vld [vmem:[%s1922_s1 + $0x98] sm:$0xff]   ;;  %v1464_v23 = vld [vmem:[%s1922_s1 + $0x90] sm:$0xff]  }
   0x9   :  { %1321 = vmatpush3.bf16.msra.mxu1 %v1448_v7  ;;  %1300 = vmatprep.subr.bf16.mxu0 %v1449_v8  ;;  %v1465_v24 = vld [vmem:[%s1922_s1 + $0x48] sm:$0xff]   ;;  %v1469_v28 = vld [vmem:[%s1922_s1 + $0x40] sm:$0xff]   ;;  %v1479_v36 = vld [vmem:[%s1922_s1 + $0x178] sm:$0xff]  }
   0xa   :  { %1322 = vmatprep.subr.bf16.mxu1 %v1450_v9  ;;  %v1466_v25 = vld [vmem:[%s1922_s1 + $0xc8] sm:$0xff]   ;;  %v1470_v29 = vld [vmem:[%s1922_s1 + $0xc0] sm:$0xff]   ;;  %v1480_v37 = vld [vmem:[%s1922_s1 + $0x1f8] sm:$0xff]  }
   0xb   :  { %v1467_v26 = vld [vmem:[%s1922_s1 + $0x8] sm:$0xff]   ;;  %v1471_v30 = vld [vmem:[%s1922_s1] sm:$0xff]   ;;  %v1481_v38 = vld [vmem:[%s1922_s1 + $0x138] sm:$0xff]  }
   0xc   :  { %1301 = vmatpush3.bf16.msra.mxu0 %v1451_v10  ;;  %v1468_v27 = vld [vmem:[%s1922_s1 + $0x88] sm:$0xff]   ;;  %v1472_v31 = vld [vmem:[%s1922_s1 + $0x80] sm:$0xff]   ;;  %v1482_v39 = vld [vmem:[%s1922_s1 + $0x1b8] sm:$0xff]  }
   0xd   :  { %1323 = vmatpush3.bf16.msra.mxu1 %v1452_v11  ;;  %1302 = vmatprep.subr.bf16.mxu0 %v1453_v12  ;;  %v1473_v32 = vld [vmem:[%s1923_s0] ss:$52 sps:$4 sm:$0xff]   ;;  %v1475_v33 = vld [vmem:[%s1923_s0 + $0x4] ss:$52 sps:$4 sm:$0xff]   ;;  %v1476_v34 = vld [vmem:[%s1923_s0 + $0x8] ss:$52 sps:$4 sm:$0xff]  }
   0xe   :  { %1324 = vmatprep.subr.bf16.mxu1 %v1454_v13  ;;  %v1478_v35 = vld [vmem:[%s1923_s0 + $0xc] ss:$52 sps:$4 sm:$0xff]   ;;  %921 = vmatprep.mubr.bf16.mxu0 %v1475_v33  ;;  %v1483_v40 = vld [vmem:[%s1922_s1 + $0x170] sm:$0xff]   ;;  %v1495_v52 = vld [vmem:[%s1922_s1 + $0x158] sm:$0xff]  }
   0xf   :  { %962 = vmatprep.mubr.bf16.mxu1 %v1478_v35  ;;  %v1484_v41 = vld [vmem:[%s1922_s1 + $0x1f0] sm:$0xff]   ;;  %v1487_v44 = vld [vmem:[%s1922_s1 + $0x168] sm:$0xff]   ;;  %v1491_v48 = vld [vmem:[%s1922_s1 + $0x160] sm:$0xff]  }
  0x10   :  { %1303 = vmatpush3.bf16.msra.mxu0 %v1455_v14  ;;  %v1485_v42 = vld [vmem:[%s1922_s1 + $0x130] sm:$0xff]   ;;  %v1488_v45 = vld [vmem:[%s1922_s1 + $0x1e8] sm:$0xff]   ;;  %v1492_v49 = vld [vmem:[%s1922_s1 + $0x1e0] sm:$0xff]  }
  0x11   :  { %1325 = vmatpush3.bf16.msra.mxu1 %v1456_v15  ;;  %1304 = vmatprep.subr.bf16.mxu0 %v1457_v16  ;;  %v1486_v43 = vld [vmem:[%s1922_s1 + $0x1b0] sm:$0xff]   ;;  %v1489_v46 = vld [vmem:[%s1922_s1 + $0x128] sm:$0xff]   ;;  %v1493_v50 = vld [vmem:[%s1922_s1 + $0x120] sm:$0xff]  }
  0x12   :  { %1326 = vmatprep.subr.bf16.mxu1 %v1458_v17  ;;  %v1490_v47 = vld [vmem:[%s1922_s1 + $0x1a8] sm:$0xff]   ;;  %v1494_v51 = vld [vmem:[%s1922_s1 + $0x1a0] sm:$0xff]   ;;  %v1496_v53 = vld [vmem:[%s1922_s1 + $0x1d8] sm:$0xff]  }
  0x13   :  { %v1497_v54 = vld [vmem:[%s1922_s1 + $0x118] sm:$0xff]   ;;  %v1499_v56 = vld [vmem:[%s1922_s1 + $0x150] sm:$0xff]   ;;  %v1503_v60 = vld [vmem:[%s1922_s1 + $0x148] sm:$0xff]  }
  0x14   :  { %1305 = vmatpush3.bf16.msra.mxu0 %v1459_v18  ;;  %v1498_v55 = vld [vmem:[%s1922_s1 + $0x198] sm:$0xff]   ;;  %v1500_v57 = vld [vmem:[%s1922_s1 + $0x1d0] sm:$0xff]   ;;  %v1504_v61 = vld [vmem:[%s1922_s1 + $0x1c8] sm:$0xff]  }
  0x15   :  { %1327 = vmatpush3.bf16.msra.mxu1 %v1460_v19  ;;  %1306 = vmatprep.subr.bf16.mxu0 %v1461_v20  ;;  %v1501_v58 = vld [vmem:[%s1922_s1 + $0x110] sm:$0xff]   ;;  %v1505_v62 = vld [vmem:[%s1922_s1 + $0x108] sm:$0xff]   ;;  %v1507_v0 = vld [vmem:[%s1922_s1 + $0x140] sm:$0xff]  }
  0x16   :  { %1328 = vmatprep.subr.bf16.mxu1 %v1462_v21  ;;  %v1502_v59 = vld [vmem:[%s1922_s1 + $0x190] sm:$0xff]   ;;  %v1506_v63 = vld [vmem:[%s1922_s1 + $0x188] sm:$0xff]   ;;  %v1508_v1 = vld [vmem:[%s1922_s1 + $0x1c0] sm:$0xff]  }
  0x17   :  { %v1509_v2 = vld [vmem:[%s1922_s1 + $0x100] sm:$0xff]   ;;  %v1513_v5 = vld [vmem:[%s1923_s0 + $0x14] ss:$52 sps:$4 sm:$0xff]   ;;  %v1514_v6 = vld [vmem:[%s1923_s0 + $0x18] ss:$52 sps:$4 sm:$0xff]  }
  0x18   :  { %1307 = vmatpush3.bf16.msra.mxu0 %v1463_v22  ;;  %v1510_v3 = vld [vmem:[%s1922_s1 + $0x180] sm:$0xff]   ;;  %v1516_v7 = vld [vmem:[%s1923_s0 + $0x1c] ss:$52 sps:$4 sm:$0xff]   ;;  %v1525_v16 = vld [vmem:[%s1922_s1 + $0x268] sm:$0xff]  }
  0x19   :  { %1329 = vmatpush3.bf16.msra.mxu1 %v1464_v23  ;;  %1308 = vmatprep.subr.bf16.mxu0 %v1465_v24  ;;  %v1511_v4 = vld [vmem:[%s1923_s0 + $0x10] ss:$52 sps:$4 sm:$0xff]   ;;  %v1517_v8 = vld [vmem:[%s1922_s1 + $0x278] sm:$0xff]   ;;  %v1526_v17 = vld [vmem:[%s1922_s1 + $0x2e8] sm:$0xff]  }
  0x1a   :  { %1330 = vmatprep.subr.bf16.mxu1 %v1466_v25  ;;  %v1518_v9 = vld [vmem:[%s1922_s1 + $0x2f8] sm:$0xff]   ;;  %v1521_v12 = vld [vmem:[%s1922_s1 + $0x270] sm:$0xff]   ;;  %v1527_v18 = vld [vmem:[%s1922_s1 + $0x228] sm:$0xff]  }
  0x1b   :  { %v1519_v10 = vld [vmem:[%s1922_s1 + $0x238] sm:$0xff]   ;;  %v1522_v13 = vld [vmem:[%s1922_s1 + $0x2f0] sm:$0xff]   ;;  %v1528_v19 = vld [vmem:[%s1922_s1 + $0x2a8] sm:$0xff]  }
  0x1c   :  { %1309 = vmatpush3.bf16.msra.mxu0 %v1467_v26  ;;  %v1520_v11 = vld [vmem:[%s1922_s1 + $0x2b8] sm:$0xff]   ;;  %v1523_v14 = vld [vmem:[%s1922_s1 + $0x230] sm:$0xff]   ;;  %v1529_v20 = vld [vmem:[%s1922_s1 + $0x260] sm:$0xff]  }
  0x1d   :  { %1331 = vmatpush3.bf16.msra.mxu1 %v1468_v27  ;;  %1310 = vmatprep.subr.bf16.mxu0 %v1469_v28  ;;  %v1524_v15 = vld [vmem:[%s1922_s1 + $0x2b0] sm:$0xff]   ;;  %v1530_v21 = vld [vmem:[%s1922_s1 + $0x2e0] sm:$0xff]   ;;  %v1533_v24 = vld [vmem:[%s1922_s1 + $0x258] sm:$0xff]  }
  0x1e   :  { %1332 = vmatprep.subr.bf16.mxu1 %v1470_v29  ;;  %v1531_v22 = vld [vmem:[%s1922_s1 + $0x220] sm:$0xff]   ;;  %v1534_v25 = vld [vmem:[%s1922_s1 + $0x2d8] sm:$0xff]   ;;  %v1537_v28 = vld [vmem:[%s1922_s1 + $0x250] sm:$0xff]  }
  0x1f   :  { %v1532_v23 = vld [vmem:[%s1922_s1 + $0x2a0] sm:$0xff]   ;;  %v1535_v26 = vld [vmem:[%s1922_s1 + $0x218] sm:$0xff]   ;;  %v1538_v29 = vld [vmem:[%s1922_s1 + $0x2d0] sm:$0xff]  }
  0x20   :  { %1311 = vmatpush3.bf16.msra.mxu0 %v1471_v30  ;;  %v1536_v27 = vld [vmem:[%s1922_s1 + $0x298] sm:$0xff]   ;;  %v1539_v30 = vld [vmem:[%s1922_s1 + $0x210] sm:$0xff]   ;;  %v1542_v33 = vld [vmem:[%s1922_s1 + $0x2c8] sm:$0xff]  }
  0x21   :  { %1333 = vmatpush3.bf16.msra.mxu1 %v1472_v31  ;;  %1340 = vmatprep.subr.bf16.mxu0 %v1479_v36  ;;  %v1540_v31 = vld [vmem:[%s1922_s1 + $0x290] sm:$0xff]   ;;  %v1544_v35 = vld [vmem:[%s1922_s1 + $0x288] sm:$0xff]   ;;  %v1545_v36 = vld [vmem:[%s1922_s1 + $0x240] sm:$0xff]  }
  0x22   :  { %1362 = vmatprep.subr.bf16.mxu1 %v1480_v37  ;;  %v1546_v37 = vld [vmem:[%s1922_s1 + $0x2c0] sm:$0xff]  }
  0x23   :  { %922 = vmatmul.mubr.bf16.vlgmr.msra.gmra.mxu0 %v1473_v32  ;;  %v1541_v32 = vld [vmem:[%s1922_s1 + $0x248] sm:$0xff]  }
  0x24   :  { %963 = vmatmul.mubr.bf16.vlgmr.msra.gmra.mxu1 %v1476_v34  ;;  %1341 = vmatpush3.bf16.msra.mxu0 %v1481_v38  ;;  %v1543_v34 = vld [vmem:[%s1922_s1 + $0x208] sm:$0xff]   ;;  %v1547_v38 = vld [vmem:[%s1922_s1 + $0x200] sm:$0xff]  }
  0x25   :  { %1363 = vmatpush3.bf16.msra.mxu1 %v1482_v39  ;;  %1342 = vmatprep.subr.bf16.mxu0 %v1483_v40  ;;  %v1548_v39 = vld [vmem:[%s1922_s1 + $0x280] sm:$0xff]  }
  0x26   :  { %1364 = vmatprep.subr.bf16.mxu1 %v1484_v41  ;;  %1003 = vmatprep.mubr.bf16.mxu0 %v1513_v5  ;;  %v1549_v40 = vld [vmem:[%s1923_s0 + $0x20] ss:$52 sps:$4 sm:$0xff]   ;;  %v1551_v41 = vld [vmem:[%s1923_s0 + $0x24] ss:$52 sps:$4 sm:$0xff]  }
  0x27   :  { %1044 = vmatprep.mubr.bf16.mxu1 %v1516_v7 }
  0x28   :  { %1343 = vmatpush3.bf16.msra.mxu0 %v1485_v42  ;;  %v1552_v42 = vld [vmem:[%s1923_s0 + $0x28] ss:$52 sps:$4 sm:$0xff]  }
  0x29   :  { %1365 = vmatpush3.bf16.msra.mxu1 %v1486_v43  ;;  %1344 = vmatprep.subr.bf16.mxu0 %v1487_v44  ;;  %v1554_v43 = vld [vmem:[%s1923_s0 + $0x2c] ss:$52 sps:$4 sm:$0xff]   ;;  %v1558_v44 = vmov 0.0  }
  0x2a   :  { %1366 = vmatprep.subr.bf16.mxu1 %v1488_v45  ;;  %v1555_v45 = vld [vmem:[%s1922_s1 + $0x308] sm:$0xff]  }
  0x2c   :  { %1345 = vmatpush3.bf16.msra.mxu0 %v1489_v46  ;;  %v1556_v46 = vld [vmem:[%s1922_s1 + $0x300] sm:$0xff]  }
  0x2d   :  { %1367 = vmatpush3.bf16.msra.mxu1 %v1490_v47  ;;  %1346 = vmatprep.subr.bf16.mxu0 %v1491_v48  ;;  %v1557_v47 = vld [vmem:[%s1923_s0 + $0x30] ss:$52 sps:$4 sm:$0xff]  }
  0x2e   :  { %1368 = vmatprep.subr.bf16.mxu1 %v1492_v49 }
  0x30   :  { %1347 = vmatpush3.bf16.msra.mxu0 %v1493_v50 }
  0x31   :  { %1369 = vmatpush3.bf16.msra.mxu1 %v1494_v51  ;;  %1348 = vmatprep.subr.bf16.mxu0 %v1495_v52 }
  0x32   :  { %1370 = vmatprep.subr.bf16.mxu1 %v1496_v53 }
  0x34   :  { %1349 = vmatpush3.bf16.msra.mxu0 %v1497_v54 }
  0x35   :  { %1371 = vmatpush3.bf16.msra.mxu1 %v1498_v55  ;;  %1350 = vmatprep.subr.bf16.mxu0 %v1499_v56 }
  0x36   :  { %1372 = vmatprep.subr.bf16.mxu1 %v1500_v57 }
  0x38   :  { %1351 = vmatpush3.bf16.msra.mxu0 %v1501_v58 }
  0x39   :  { %1373 = vmatpush3.bf16.msra.mxu1 %v1502_v59  ;;  %1352 = vmatprep.subr.bf16.mxu0 %v1503_v60  ;;  %v1183_v60 = vld [vmem:[%s1924_s2] ss:$0 sm:$0xff] }
  0x3a   :  { %1374 = vmatprep.subr.bf16.mxu1 %v1504_v61 }
  0x3c   :  { %1353 = vmatpush3.bf16.msra.mxu0 %v1505_v62 }
  0x3d   :  { %1375 = vmatpush3.bf16.msra.mxu1 %v1506_v63  ;;  %1354 = vmatprep.subr.bf16.mxu0 %v1507_v0 }
  0x3e   :  { %1376 = vmatprep.subr.bf16.mxu1 %v1508_v1 }
  0x40   :  { %1355 = vmatpush3.bf16.msra.mxu0 %v1509_v2 }
  0x41   :  { %1377 = vmatpush3.bf16.msra.mxu1 %v1510_v3  ;;  %1384 = vmatprep.subr.bf16.mxu0 %v1517_v8 }
  0x42   :  { %1406 = vmatprep.subr.bf16.mxu1 %v1518_v9 }
  0x43   :  { %1004 = vmatmul.mubr.bf16.vlgmr.msra.gmra.mxu0 %v1511_v4 }
  0x44   :  { %1045 = vmatmul.mubr.bf16.vlgmr.msra.gmra.mxu1 %v1514_v6  ;;  %1385 = vmatpush3.bf16.msra.mxu0 %v1519_v10 }
  0x45   :  { %1407 = vmatpush3.bf16.msra.mxu1 %v1520_v11  ;;  %1386 = vmatprep.subr.bf16.mxu0 %v1521_v12 }
  0x46   :  { %1408 = vmatprep.subr.bf16.mxu1 %v1522_v13  ;;  %1085 = vmatprep.mubr.bf16.mxu0 %v1551_v41 }
  0x47   :  { %1126 = vmatprep.mubr.bf16.mxu1 %v1554_v43 }
  0x48   :  { %1387 = vmatpush3.bf16.msra.mxu0 %v1523_v14 }
  0x49   :  { %1409 = vmatpush3.bf16.msra.mxu1 %v1524_v15  ;;  %1388 = vmatprep.subr.bf16.mxu0 %v1525_v16 }
  0x4a   :  { %1410 = vmatprep.subr.bf16.mxu1 %v1526_v17 }
  0x4c   :  { %1389 = vmatpush3.bf16.msra.mxu0 %v1527_v18 }
  0x4d   :  { %1411 = vmatpush3.bf16.msra.mxu1 %v1528_v19  ;;  %1390 = vmatprep.subr.bf16.mxu0 %v1529_v20 }
  0x4e   :  { %1412 = vmatprep.subr.bf16.mxu1 %v1530_v21 }
  0x50   :  { %1391 = vmatpush3.bf16.msra.mxu0 %v1531_v22 }
  0x51   :  { %1413 = vmatpush3.bf16.msra.mxu1 %v1532_v23  ;;  %1392 = vmatprep.subr.bf16.mxu0 %v1533_v24 }
  0x52   :  { %1414 = vmatprep.subr.bf16.mxu1 %v1534_v25 }
  0x54   :  { %1393 = vmatpush3.bf16.msra.mxu0 %v1535_v26 }
  0x55   :  { %1415 = vmatpush3.bf16.msra.mxu1 %v1536_v27  ;;  %1394 = vmatprep.subr.bf16.mxu0 %v1537_v28 }
  0x56   :  { %1416 = vmatprep.subr.bf16.mxu1 %v1538_v29 }
  0x58   :  { %1395 = vmatpush3.bf16.msra.mxu0 %v1539_v30 }
  0x59   :  { %1417 = vmatpush3.bf16.msra.mxu1 %v1540_v31  ;;  %1396 = vmatprep.subr.bf16.mxu0 %v1541_v32 }
  0x5a   :  { %1418 = vmatprep.subr.bf16.mxu1 %v1542_v33 }
  0x5c   :  { %1397 = vmatpush3.bf16.msra.mxu0 %v1543_v34 }
  0x5d   :  { %1419 = vmatpush3.bf16.msra.mxu1 %v1544_v35  ;;  %1398 = vmatprep.subr.bf16.mxu0 %v1545_v36 }
  0x5e   :  { %1420 = vmatprep.subr.bf16.mxu1 %v1546_v37 }
  0x60   :  { %1399 = vmatpush3.bf16.msra.mxu0 %v1547_v38 }
  0x61   :  { %1421 = vmatpush3.bf16.msra.mxu1 %v1548_v39  ;;  %1431 = vmatprep.subr.bf16.mxu0 %v1558_v44 }
  0x63   :  { %1086 = vmatmul.mubr.bf16.vlgmr.msra.gmra.mxu0 %v1549_v40 }
  0x64   :  { %1127 = vmatmul.mubr.bf16.vlgmr.msra.gmra.mxu1 %v1552_v42  ;;  %1432 = vmatpush3.bf16.msra.mxu0 %v1555_v45 }
  0x65   :  { %1433 = vmatprep.subr.bf16.mxu0 %v1558_v44  ;;  %1435 = vmatprep.mubr.msk.bf16.mxu0 %vm1559_vm0, %v1558_v44 }
  0x68   :  { %1434 = vmatpush3.bf16.msra.mxu0 %v1556_v46 }
  0x6b   :  { %1436 = vmatmul.mubr.msk.bf16.vlgmr.msra.gmra.mxu0 %vm885_vm1, %v1557_v47 }
  0xe3   :  { %v1312_v48 = vpop.f32.mrf.mxu0 }
  0xe4   :  { %v1334_v49 = vpop.f32.mrf.mxu1 }
  0xe5   :  { %v1313_v50 = vpop.f32.mrf.mxu0 }
  0xe6   :  { %v1335_v51 = vpop.f32.mrf.mxu1  ;;  %v1314_v59 = vadd.f32 %v1313_v50, %v1312_v48 }
  0xe7   :  { %v1315_v52 = vpop.f32.mrf.mxu0  ;;  %v1336_v0 = vadd.f32 %v1335_v51, %v1334_v49 }
  0xe8   :  { %v1337_v53 = vpop.f32.mrf.mxu1  ;;  %v924_v63 = vadd.f32 %v1314_v59, %v1183_v60 }
  0xe9   :  { %v1316_v54 = vpop.f32.mrf.mxu0 }
  0xea   :  { %v1338_v56 = vpop.f32.mrf.mxu1  ;;  %v1317_v1 = vadd.f32 %v1316_v54, %v1315_v52  ;;  %v965_v5 = vadd.f32 %v1336_v0, %v924_v63 }
  0xeb   :  { %v1339_v7 = vadd.f32 %v1338_v56, %v1337_v53 }
  0xec   :  { %v927_v6 = vadd.f32 %v1317_v1, %v1183_v60 }
  0xee   :  { %v968_v13 = vadd.f32 %v1339_v7, %v927_v6 }
 0x103   :  { %v1356_v55 = vpop.f32.mrf.mxu0 }
 0x104   :  { %v1378_v57 = vpop.f32.mrf.mxu1 }
 0x105   :  { %v1357_v58 = vpop.f32.mrf.mxu0 }
 0x106   :  { %v1379_v61 = vpop.f32.mrf.mxu1  ;;  %v1358_v2 = vadd.f32 %v1357_v58, %v1356_v55 }
 0x107   :  { %v1359_v62 = vpop.f32.mrf.mxu0  ;;  %v1380_v9 = vadd.f32 %v1379_v61, %v1378_v57 }
 0x108   :  { %v1381_v3 = vpop.f32.mrf.mxu1  ;;  %v1006_v8 = vadd.f32 %v1358_v2, %v965_v5 }
 0x109   :  { %v1360_v4 = vpop.f32.mrf.mxu0 }
 0x10a   :  { %v1361_v10 = vadd.f32 %v1360_v4, %v1359_v62  ;;  %v1382_v11 = vpop.f32.mrf.mxu1  ;;  %v1047_v16 = vadd.f32 %v1380_v9, %v1006_v8 }
 0x10b   :  { %v1383_v21 = vadd.f32 %v1382_v11, %v1381_v3 }
 0x10c   :  { %v1009_v17 = vadd.f32 %v1361_v10, %v968_v13 }
 0x10e   :  { %v1050_v26 = vadd.f32 %v1383_v21, %v1009_v17 }
 0x123   :  { %v1400_v12 = vpop.f32.mrf.mxu0 }
 0x124   :  { %v1422_v14 = vpop.f32.mrf.mxu1 }
 0x125   :  { %v1401_v15 = vpop.f32.mrf.mxu0 }
 0x126   :  { %v1402_v18 = vadd.f32 %v1401_v15, %v1400_v12  ;;  %v1423_v19 = vpop.f32.mrf.mxu1 }
 0x127   :  { %v1403_v20 = vpop.f32.mrf.mxu0  ;;  %v1424_v23 = vadd.f32 %v1423_v19, %v1422_v14 }
 0x128   :  { %v1088_v22 = vadd.f32 %v1402_v18, %v1047_v16  ;;  %v1425_v24 = vpop.f32.mrf.mxu1 }
 0x129   :  { %v1404_v25 = vpop.f32.mrf.mxu0 }
 0x12a   :  { %v1405_v27 = vadd.f32 %v1404_v25, %v1403_v20  ;;  %v1426_v28 = vpop.f32.mrf.mxu1  ;;  %v1129_v29 = vadd.f32 %v1424_v23, %v1088_v22 }
 0x12b   :  { %v1169_v30 = vpop.f32.mrf.mxu0  ;;  %v1427_v32 = vadd.f32 %v1426_v28, %v1425_v24 }
 0x12c   :  { %v1091_v31 = vadd.f32 %v1405_v27, %v1050_v26  ;;  %v1170_v33 = vadd.f32 %v1169_v30, %v1129_v29 }
 0x12d   :  { %v1437_v34 = vpop.f32.mrf.mxu0 }
 0x12e   :  { %1177 = vst.msk [vmem:[%s1925_s3] sm:$0xff] %vm1176_vm2, %v1170_v33  ;;  %v1132_v35 = vadd.f32 %v1427_v32, %v1091_v31 }
 0x12f   :  { %v1172_v36 = vpop.f32.mrf.mxu0 }
 0x130   :  { %v1173_v37 = vadd.f32 %v1172_v36, %v1132_v35 }
 0x131   :  { %v1438_v38 = vpop.f32.mrf.mxu0 }
 0x132   :  { %1178 = vst.msk [vmem:[%s1925_s3 + $0x8] sm:$0xff] %vm1176_vm2, %v1173_v37 }

</bundles_post_ra>
